<compile_context>
chip_gen: v5e
topology: v5e:2x2
jax: 0.10.0
libtpu: 0.0.40
codegen_flags: <defaults>
</compile_context>

<pallas_src>
import functools

import jax
import jax.numpy as jnp
from jax.experimental import pallas as pl
from jax.experimental.pallas import tpu as pltpu


def _acol_kernel(deltas_ref, onehot_ref, x_ref, w_ref, bias_ref,
                 cls_ref, cam_ref, scores_ref, *, n_cls, nbp, hw, bb):
    """One grid step == one slab of `bb` batch elements.

    deltas_ref : SMEM (n_cls,)               f32  erase thresholds
    onehot_ref : VMEM (bb, nbp, 1)           f32  one-hot of the GT label (padded)
    x_ref      : VMEM (bb, C, hw)            f32  backbone features, NCHW-native
    w_ref      : VMEM (n_cls*nbp, C)         f32  packed 1x1-conv weights (padded)
    bias_ref   : VMEM (n_cls*nbp, 1)         f32  packed conv biases (padded)
    cls_ref    : VMEM (bb, n_cls*nbp, 1)     f32  classifier logits (padded)
    cam_ref    : VMEM (bb, n_cls, hw)        f32  normalized CAMs
    scores_ref : VMEM (bb, n_cls*nbp, hw)    f32  scratch: W_packed @ x per element
    """
    # ---- 1) MXU: one standard (M,K)x(K,N) dot per slab element -------------
    # scores[i] = W_packed (rows, C) @ x[i] (C, hw): C contracts off the sublane
    # axis exactly as the features arrive from HBM; HW stays on lanes.
    if bb <= 8:
        for i in range(bb):
            scores_ref[i] = jnp.dot(w_ref[...], x_ref[i],
                                    preferred_element_type=jnp.float32)
    else:
        @pl.loop(0, bb)
        def _(i):
            scores_ref[i] = jnp.dot(w_ref[...], x_ref[i],
                                    preferred_element_type=jnp.float32)

    # ---- 2) VPU/XLU: all heads, vectorized over the whole slab -------------
    onehot = onehot_ref[...]                          # (bb, nbp, 1)
    keep = jnp.ones((bb, 1, hw), jnp.float32)         # cumulative erase keep-mask
    inv_hw = 1.0 / hw

    for idx in range(n_cls):                          # static; sequential via `keep`
        lo = idx * nbp
        hi = lo + nbp
        # Erasing zeroes whole spatial positions of x, so conv(x_erased) ==
        # keep * conv(x_original) (bias excluded here, added below).
        s_h = scores_ref[:, lo:hi, :] * keep          # (bb, nbp, hw)

        # Conv -> AvgPool(7x7) -> squeeze == spatial mean of conv scores + bias.
        cls_ref[:, lo:hi, :] = (jnp.sum(s_h, axis=2, keepdims=True) * inv_hw
                                + bias_ref[lo:hi, :])

        # CAM: score row of the ground-truth class, min-max normalized over HW.
        A = jnp.sum(s_h * onehot, axis=1, keepdims=True)       # (bb, 1, hw)
        mn = jnp.min(A, axis=2, keepdims=True)
        mx = jnp.max(A, axis=2, keepdims=True)
        denom = mx - mn
        # Guard against a constant response map (reference would emit NaN/Inf
        # from 0/0 here; we deliberately emit 0).  Exact division kept so the
        # cam <= delta comparison matches the f32 reference.
        cam = (A - mn) / jnp.where(denom != 0.0, denom, 1.0)
        cam_ref[:, idx:idx + 1, :] = cam

        # Adversarial erasing for the next head: fold into the cumulative mask.
        if idx < n_cls - 1:
            keep = keep * (cam <= deltas_ref[idx]).astype(jnp.float32)


def _pick_batch_block(batch, max_bb):
    """Largest divisor of `batch` <= max_bb, preferring >= 2 grid steps (v7x 2 TCs)."""
    divisors = [d for d in range(1, batch + 1) if batch % d == 0 and d <= max_bb]
    two_step = [d for d in divisors if batch // d >= 2]
    pool = two_step if two_step else divisors
    return max(pool)


def acol_forward(feats_nchw, labels, weights, biases, deltas, *, max_block_batch=32):
    """feats_nchw: (B, C, H, W); labels: (B,) int; weights: (n_cls, NB, C);
    biases: (n_cls, NB); deltas: (n_cls,).
    Returns (cls_output (n_cls, B, NB), cams (n_cls, B, H, W)) like the PyTorch module."""
    B, C, H, W = feats_nchw.shape
    HW = H * W
    n_cls, NB, _ = weights.shape
    NBp = ((NB + 7) // 8) * 8            # pad per-head classes to a sublane tile
    ROWS = n_cls * NBp

    BB = _pick_batch_block(B, max_block_batch)
    G = B // BB

    # NCHW-native: only a free reshape, no relayout of the dominant tensor.
    x = jnp.reshape(jnp.asarray(feats_nchw, jnp.float32), (B, C, HW))

    # Pack all heads' 1x1-conv weights as (n_cls*NBp, C): standard LHS of the dot,
    # zero-padded rows per head so head slices are sublane-aligned.
    w_pad = jnp.zeros((n_cls, NBp, C), jnp.float32).at[:, :NB, :].set(
        jnp.asarray(weights, jnp.float32))
    w_packed = w_pad.reshape(ROWS, C)
    b_pad = jnp.zeros((n_cls, NBp), jnp.float32).at[:, :NB].set(
        jnp.asarray(biases, jnp.float32))
    b_packed = b_pad.reshape(ROWS, 1)

    # Ground-truth-class selector built once in the wrapper (tiny: B*NBp floats).
    onehot = jax.nn.one_hot(labels, NBp, dtype=jnp.float32).reshape(B, NBp, 1)
    deltas = jnp.asarray(deltas, jnp.float32)

    kernel = functools.partial(_acol_kernel, n_cls=n_cls, nbp=NBp, hw=HW, bb=BB)

    # VMEM budget: double-buffered feature slab + resident weights + scores scratch.
    est = 4 * (2 * BB * C * HW + 2 * ROWS * C + BB * ROWS * HW + 8 * BB * ROWS)
    vmem_limit = max(32 << 20, min(64 << 20, int(est * 1.25) + (8 << 20)))

    cls_pad, cams = pl.pallas_call(
        kernel,
        out_shape=(
            jax.ShapeDtypeStruct((B, ROWS, 1), jnp.float32),
            jax.ShapeDtypeStruct((B, n_cls, HW), jnp.float32),
        ),
        grid_spec=pltpu.PrefetchScalarGridSpec(
            num_scalar_prefetch=0,
            grid=(G,),
            in_specs=[
                pl.BlockSpec(memory_space=pltpu.MemorySpace.SMEM),   # deltas (n_cls,)
                pl.BlockSpec((BB, NBp, 1), lambda g: (g, 0, 0)),     # one-hot labels
                pl.BlockSpec((BB, C, HW), lambda g: (g, 0, 0)),      # feature slab
                pl.BlockSpec((ROWS, C), lambda g: (0, 0)),           # packed weights
                pl.BlockSpec((ROWS, 1), lambda g: (0, 0)),           # packed biases
            ],
            out_specs=(
                pl.BlockSpec((BB, ROWS, 1), lambda g: (g, 0, 0)),    # logits (padded)
                pl.BlockSpec((BB, n_cls, HW), lambda g: (g, 0, 0)),  # cams
            ),
            scratch_shapes=[pltpu.VMEM((BB, ROWS, HW), jnp.float32)],
        ),
        compiler_params=pltpu.CompilerParams(
            dimension_semantics=("parallel",),
            vmem_limit_bytes=vmem_limit),
    )(deltas, onehot, x, w_packed, b_packed)

    # Back to the PyTorch return convention (tiny tensors: cheap wrapper relayout).
    cls_out = cls_pad.reshape(B, n_cls, NBp)[:, :, :NB]
    v_cls_output = jnp.transpose(cls_out, (1, 0, 2))                   # (n_cls, B, NB)
    v_cams = jnp.transpose(cams, (1, 0, 2)).reshape(n_cls, B, H, W)    # (n_cls, B, H, W)
    return v_cls_output, v_cams


def acol_reference(feats_nchw, labels, weights, biases, deltas):
    """Pure-JAX reference mirroring the PyTorch forward."""
    B, C, H, W = feats_nchw.shape
    n_cls = weights.shape[0]
    x = feats_nchw
    cls_out, cams = [], []
    for idx in range(n_cls):
        s = (jnp.einsum('bchw,kc->bkhw', x, weights[idx])
             + biases[idx][None, :, None, None])
        cls_out.append(jnp.mean(s, axis=(2, 3)))                       # AvgPool(7)+squeeze
        w_c = weights[idx][labels]                                     # (B, C)
        A = jnp.einsum('bchw,bc->bhw', x, w_c)
        mn = A.min(axis=(1, 2), keepdims=True)
        mx = A.max(axis=(1, 2), keepdims=True)
        cam = (A - mn) / (mx - mn)
        cams.append(cam)
        if idx < n_cls - 1:
            mask = (cam > deltas[idx])[:, None, :, :]
            x = jnp.where(mask, 0.0, x)
    return jnp.stack(cls_out), jnp.stack(cams)


if __name__ == "__main__":
    B, C, H, W = 2, 2048, 7, 7       # C=2048 and 7x7 are fixed by the module
    NB = 10                          # nb_classes
    N_CLS = 3                        # len(cls_recipe)

    key = jax.random.PRNGKey(0)
    k_feat, k_w, k_b, k_lab = jax.random.split(key, 4)

    feats = jax.random.normal(k_feat, (B, C, H, W), dtype=jnp.float32)
    weights = 0.02 * jax.random.normal(k_w, (N_CLS, NB, C), dtype=jnp.float32)
    biases = 0.01 * jax.random.normal(k_b, (N_CLS, NB), dtype=jnp.float32)
    labels = jax.random.randint(k_lab, (B,), 0, NB, dtype=jnp.int32)
    deltas = jnp.array([0.6, 0.7, 0.0], dtype=jnp.float32)

    v_cls, v_cams = acol_forward(feats, labels, weights, biases, deltas)
    jax.block_until_ready((v_cls, v_cams))

    ref_cls, ref_cams = acol_reference(feats, labels, weights, biases, deltas)

    assert v_cls.shape == (N_CLS, B, NB)
    assert v_cams.shape == (N_CLS, B, H, W)
    assert jnp.allclose(v_cls, ref_cls, rtol=1e-4, atol=1e-4)
    assert jnp.allclose(v_cams, ref_cams, rtol=1e-4, atol=1e-4)

    print("KERNEL_OK")
</pallas_src>

<mosaic_0001>
module attributes {stable_mosaic.version = 11 : i64} {
  func.func @_acol_kernel(%arg0: i32, %arg1: memref<3xf32, #tpu.memory_space<smem>>, %arg2: memref<1x16x1xf32, #tpu.memory_space<vmem>>, %arg3: memref<1x2048x49xf32, #tpu.memory_space<vmem>>, %arg4: memref<48x2048xf32, #tpu.memory_space<vmem>>, %arg5: memref<48x1xf32, #tpu.memory_space<vmem>>, %arg6: memref<1x48x1xf32, #tpu.memory_space<vmem>>, %arg7: memref<1x3x49xf32, #tpu.memory_space<vmem>>, %arg8: memref<1x48x49xf32, #tpu.memory_space<vmem>>) attributes {dimension_semantics = [#tpu.dimension_semantics<parallel>], iteration_bounds = array<i64: 2>, scalar_prefetch = 0 : i64, scratch_operands = 1 : i64, tpu.core_type = #tpu.core_type<tc>, window_params = [{transform_indices = @transform_0, window_bounds = array<i64: 3>}, {transform_indices = @transform_1, window_bounds = array<i64: 1, 16, 1>}, {transform_indices = @transform_2, window_bounds = array<i64: 1, 2048, 49>}, {pipeline_mode = #tpu.pipeline_mode<synchronous>, transform_indices = @transform_3, window_bounds = array<i64: 48, 2048>}, {pipeline_mode = #tpu.pipeline_mode<synchronous>, transform_indices = @transform_4, window_bounds = array<i64: 48, 1>}, {transform_indices = @transform_5, window_bounds = array<i64: 1, 48, 1>}, {transform_indices = @transform_6, window_bounds = array<i64: 1, 3, 49>}]} {
    %c0 = arith.constant 0 : index
    %c0_0 = arith.constant 0 : index
    %0 = vector.load %arg4[%c0, %c0_0] : memref<48x2048xf32, #tpu.memory_space<vmem>>, vector<48x2048xf32>
    %c0_1 = arith.constant 0 : index
    %c0_2 = arith.constant 0 : index
    %c0_3 = arith.constant 0 : index
    %1 = vector.load %arg3[%c0_1, %c0_2, %c0_3] : memref<1x2048x49xf32, #tpu.memory_space<vmem>>, vector<1x2048x49xf32>
    %2 = vector.shape_cast %1 : vector<1x2048x49xf32> to vector<2048x49xf32>
    %cst = arith.constant dense<0.000000e+00> : vector<48x49xf32>
    %3 = tpu.matmul %0, %2, %cst {dimension_numbers = #tpu.dot_dimension_numbers<[1], [0], [0], [1], [0, 0, 1, 1], [], []>} : vector<48x2048xf32>, vector<2048x49xf32>, vector<48x49xf32> -> vector<48x49xf32>
    %c0_4 = arith.constant 0 : index
    %c0_5 = arith.constant 0 : index
    %c0_6 = arith.constant 0 : index
    %4 = vector.load %arg8[%c0_4, %c0_5, %c0_6] : memref<1x48x49xf32, #tpu.memory_space<vmem>>, vector<1x48x49xf32>
    %5 = vector.shape_cast %4 : vector<1x48x49xf32> to vector<48x49xf32>
    %6 = vector.shape_cast %3 : vector<48x49xf32> to vector<1x48x49xf32>
    tpu.vector_store %arg8[%c0_4, %c0_5, %c0_6], %6 {strides = array<i32>} : memref<1x48x49xf32, #tpu.memory_space<vmem>>, vector<1x48x49xf32>,
    %c0_7 = arith.constant 0 : index
    %c0_8 = arith.constant 0 : index
    %c0_9 = arith.constant 0 : index
    %7 = vector.load %arg2[%c0_7, %c0_8, %c0_9] : memref<1x16x1xf32, #tpu.memory_space<vmem>>, vector<1x16x1xf32>
    %cst_10 = arith.constant 1.000000e+00 : f32
    %8 = vector.broadcast %cst_10 : f32 to vector<1x1x49xf32>
    %c0_11 = arith.constant 0 : index
    %c0_12 = arith.constant 0 : index
    %c0_13 = arith.constant 0 : index
    %9 = vector.load %arg8[%c0_11, %c0_12, %c0_13] : memref<1x48x49xf32, #tpu.memory_space<vmem>>, vector<1x16x49xf32>
    %10 = vector.broadcast %8 : vector<1x1x49xf32> to vector<1x16x49xf32>
    %11 = arith.mulf %9, %10 : vector<1x16x49xf32>
    %cst_14 = arith.constant dense<0.000000e+00> : vector<1x16xf32>
    %12 = vector.multi_reduction <add>, %11, %cst_14 [2] : vector<1x16x49xf32> to vector<1x16xf32>
    %13 = vector.shape_cast %12 : vector<1x16xf32> to vector<1x16x1xf32>
    %cst_15 = arith.constant 0.0204081628 : f32
    %14 = vector.broadcast %cst_15 : f32 to vector<1x16x1xf32>
    %15 = arith.mulf %13, %14 : vector<1x16x1xf32>
    %c0_16 = arith.constant 0 : index
    %c0_17 = arith.constant 0 : index
    %16 = vector.load %arg5[%c0_16, %c0_17] : memref<48x1xf32, #tpu.memory_space<vmem>>, vector<16x1xf32>
    %17 = vector.shape_cast %16 : vector<16x1xf32> to vector<1x16x1xf32>
    %18 = arith.addf %15, %17 : vector<1x16x1xf32>
    %c0_18 = arith.constant 0 : index
    %c0_19 = arith.constant 0 : index
    %c0_20 = arith.constant 0 : index
    %19 = vector.load %arg6[%c0_18, %c0_19, %c0_20] : memref<1x48x1xf32, #tpu.memory_space<vmem>>, vector<1x16x1xf32>
    tpu.vector_store %arg6[%c0_18, %c0_19, %c0_20], %18 {strides = array<i32>} : memref<1x48x1xf32, #tpu.memory_space<vmem>>, vector<1x16x1xf32>,
    %20 = vector.broadcast %7 : vector<1x16x1xf32> to vector<1x16x49xf32>
    %21 = arith.mulf %11, %20 : vector<1x16x49xf32>
    %cst_21 = arith.constant dense<0.000000e+00> : vector<1x49xf32>
    %22 = vector.multi_reduction <add>, %21, %cst_21 [1] : vector<1x16x49xf32> to vector<1x49xf32>
    %23 = vector.shape_cast %22 : vector<1x49xf32> to vector<1x1x49xf32>
    %cst_22 = arith.constant dense<0x7F800000> : vector<1x1xf32>
    %24 = vector.multi_reduction <minimumf>, %23, %cst_22 [2] : vector<1x1x49xf32> to vector<1x1xf32>
    %25 = vector.shape_cast %24 : vector<1x1xf32> to vector<1x1x1xf32>
    %cst_23 = arith.constant dense<0xFF800000> : vector<1x1xf32>
    %26 = vector.multi_reduction <maximumf>, %23, %cst_23 [2] : vector<1x1x49xf32> to vector<1x1xf32>
    %27 = vector.shape_cast %26 : vector<1x1xf32> to vector<1x1x1xf32>
    %28 = arith.subf %27, %25 : vector<1x1x1xf32>
    %29 = vector.broadcast %25 : vector<1x1x1xf32> to vector<1x1x49xf32>
    %30 = arith.subf %23, %29 : vector<1x1x49xf32>
    %cst_24 = arith.constant 0.000000e+00 : f32
    %31 = vector.broadcast %cst_24 : f32 to vector<1x1x1xf32>
    %32 = arith.cmpf one, %28, %31 : vector<1x1x1xf32>
    %cst_25 = arith.constant 1.000000e+00 : f32
    %33 = vector.broadcast %cst_25 : f32 to vector<1x1x1xf32>
    %34 = arith.select %32, %28, %33 : vector<1x1x1xi1>, vector<1x1x1xf32>
    %35 = vector.broadcast %34 : vector<1x1x1xf32> to vector<1x1x49xf32>
    %36 = arith.divf %30, %35 : vector<1x1x49xf32>
    %c0_26 = arith.constant 0 : index
    %c0_27 = arith.constant 0 : index
    %c0_28 = arith.constant 0 : index
    %37 = vector.load %arg7[%c0_26, %c0_27, %c0_28] : memref<1x3x49xf32, #tpu.memory_space<vmem>>, vector<1x1x49xf32>
    tpu.vector_store %arg7[%c0_26, %c0_27, %c0_28], %36 {strides = array<i32>} : memref<1x3x49xf32, #tpu.memory_space<vmem>>, vector<1x1x49xf32>,
    %c0_29 = arith.constant 0 : index
    %38 = memref.load %arg1[%c0_29] : memref<3xf32, #tpu.memory_space<smem>>
    %39 = vector.broadcast %38 : f32 to vector<1x1x49xf32>
    %40 = arith.cmpf ole, %36, %39 : vector<1x1x49xf32>
    %41 = arith.extui %40 : vector<1x1x49xi1> to vector<1x1x49xi32>
    %42 = arith.sitofp %41 : vector<1x1x49xi32> to vector<1x1x49xf32>
    %43 = arith.mulf %8, %42 : vector<1x1x49xf32>
    %c0_30 = arith.constant 0 : index
    %c16 = arith.constant 16 : index
    %c0_31 = arith.constant 0 : index
    %44 = vector.load %arg8[%c0_30, %c16, %c0_31] : memref<1x48x49xf32, #tpu.memory_space<vmem>>, vector<1x16x49xf32>
    %45 = vector.broadcast %43 : vector<1x1x49xf32> to vector<1x16x49xf32>
    %46 = arith.mulf %44, %45 : vector<1x16x49xf32>
    %cst_32 = arith.constant dense<0.000000e+00> : vector<1x16xf32>
    %47 = vector.multi_reduction <add>, %46, %cst_32 [2] : vector<1x16x49xf32> to vector<1x16xf32>
    %48 = vector.shape_cast %47 : vector<1x16xf32> to vector<1x16x1xf32>
    %cst_33 = arith.constant 0.0204081628 : f32
    %49 = vector.broadcast %cst_33 : f32 to vector<1x16x1xf32>
    %50 = arith.mulf %48, %49 : vector<1x16x1xf32>
    %c16_34 = arith.constant 16 : index
    %c0_35 = arith.constant 0 : index
    %51 = vector.load %arg5[%c16_34, %c0_35] : memref<48x1xf32, #tpu.memory_space<vmem>>, vector<16x1xf32>
    %52 = vector.shape_cast %51 : vector<16x1xf32> to vector<1x16x1xf32>
    %53 = arith.addf %50, %52 : vector<1x16x1xf32>
    %c0_36 = arith.constant 0 : index
    %c16_37 = arith.constant 16 : index
    %c0_38 = arith.constant 0 : index
    %54 = vector.load %arg6[%c0_36, %c16_37, %c0_38] : memref<1x48x1xf32, #tpu.memory_space<vmem>>, vector<1x16x1xf32>
    tpu.vector_store %arg6[%c0_36, %c16_37, %c0_38], %53 {strides = array<i32>} : memref<1x48x1xf32, #tpu.memory_space<vmem>>, vector<1x16x1xf32>,
    %55 = vector.broadcast %7 : vector<1x16x1xf32> to vector<1x16x49xf32>
    %56 = arith.mulf %46, %55 : vector<1x16x49xf32>
    %cst_39 = arith.constant dense<0.000000e+00> : vector<1x49xf32>
    %57 = vector.multi_reduction <add>, %56, %cst_39 [1] : vector<1x16x49xf32> to vector<1x49xf32>
    %58 = vector.shape_cast %57 : vector<1x49xf32> to vector<1x1x49xf32>
    %cst_40 = arith.constant dense<0x7F800000> : vector<1x1xf32>
    %59 = vector.multi_reduction <minimumf>, %58, %cst_40 [2] : vector<1x1x49xf32> to vector<1x1xf32>
    %60 = vector.shape_cast %59 : vector<1x1xf32> to vector<1x1x1xf32>
    %cst_41 = arith.constant dense<0xFF800000> : vector<1x1xf32>
    %61 = vector.multi_reduction <maximumf>, %58, %cst_41 [2] : vector<1x1x49xf32> to vector<1x1xf32>
    %62 = vector.shape_cast %61 : vector<1x1xf32> to vector<1x1x1xf32>
    %63 = arith.subf %62, %60 : vector<1x1x1xf32>
    %64 = vector.broadcast %60 : vector<1x1x1xf32> to vector<1x1x49xf32>
    %65 = arith.subf %58, %64 : vector<1x1x49xf32>
    %cst_42 = arith.constant 0.000000e+00 : f32
    %66 = vector.broadcast %cst_42 : f32 to vector<1x1x1xf32>
    %67 = arith.cmpf one, %63, %66 : vector<1x1x1xf32>
    %cst_43 = arith.constant 1.000000e+00 : f32
    %68 = vector.broadcast %cst_43 : f32 to vector<1x1x1xf32>
    %69 = arith.select %67, %63, %68 : vector<1x1x1xi1>, vector<1x1x1xf32>
    %70 = vector.broadcast %69 : vector<1x1x1xf32> to vector<1x1x49xf32>
    %71 = arith.divf %65, %70 : vector<1x1x49xf32>
    %c0_44 = arith.constant 0 : index
    %c1 = arith.constant 1 : index
    %c0_45 = arith.constant 0 : index
    %72 = vector.load %arg7[%c0_44, %c1, %c0_45] : memref<1x3x49xf32, #tpu.memory_space<vmem>>, vector<1x1x49xf32>
    tpu.vector_store %arg7[%c0_44, %c1, %c0_45], %71 {strides = array<i32>} : memref<1x3x49xf32, #tpu.memory_space<vmem>>, vector<1x1x49xf32>,
    %c1_46 = arith.constant 1 : index
    %73 = memref.load %arg1[%c1_46] : memref<3xf32, #tpu.memory_space<smem>>
    %74 = vector.broadcast %73 : f32 to vector<1x1x49xf32>
    %75 = arith.cmpf ole, %71, %74 : vector<1x1x49xf32>
    %76 = arith.extui %75 : vector<1x1x49xi1> to vector<1x1x49xi32>
    %77 = arith.sitofp %76 : vector<1x1x49xi32> to vector<1x1x49xf32>
    %78 = arith.mulf %43, %77 : vector<1x1x49xf32>
    %c0_47 = arith.constant 0 : index
    %c32 = arith.constant 32 : index
    %c0_48 = arith.constant 0 : index
    %79 = vector.load %arg8[%c0_47, %c32, %c0_48] : memref<1x48x49xf32, #tpu.memory_space<vmem>>, vector<1x16x49xf32>
    %80 = vector.broadcast %78 : vector<1x1x49xf32> to vector<1x16x49xf32>
    %81 = arith.mulf %79, %80 : vector<1x16x49xf32>
    %cst_49 = arith.constant dense<0.000000e+00> : vector<1x16xf32>
    %82 = vector.multi_reduction <add>, %81, %cst_49 [2] : vector<1x16x49xf32> to vector<1x16xf32>
    %83 = vector.shape_cast %82 : vector<1x16xf32> to vector<1x16x1xf32>
    %cst_50 = arith.constant 0.0204081628 : f32
    %84 = vector.broadcast %cst_50 : f32 to vector<1x16x1xf32>
    %85 = arith.mulf %83, %84 : vector<1x16x1xf32>
    %c32_51 = arith.constant 32 : index
    %c0_52 = arith.constant 0 : index
    %86 = vector.load %arg5[%c32_51, %c0_52] : memref<48x1xf32, #tpu.memory_space<vmem>>, vector<16x1xf32>
    %87 = vector.shape_cast %86 : vector<16x1xf32> to vector<1x16x1xf32>
    %88 = arith.addf %85, %87 : vector<1x16x1xf32>
    %c0_53 = arith.constant 0 : index
    %c32_54 = arith.constant 32 : index
    %c0_55 = arith.constant 0 : index
    %89 = vector.load %arg6[%c0_53, %c32_54, %c0_55] : memref<1x48x1xf32, #tpu.memory_space<vmem>>, vector<1x16x1xf32>
    tpu.vector_store %arg6[%c0_53, %c32_54, %c0_55], %88 {strides = array<i32>} : memref<1x48x1xf32, #tpu.memory_space<vmem>>, vector<1x16x1xf32>,
    %90 = vector.broadcast %7 : vector<1x16x1xf32> to vector<1x16x49xf32>
    %91 = arith.mulf %81, %90 : vector<1x16x49xf32>
    %cst_56 = arith.constant dense<0.000000e+00> : vector<1x49xf32>
    %92 = vector.multi_reduction <add>, %91, %cst_56 [1] : vector<1x16x49xf32> to vector<1x49xf32>
    %93 = vector.shape_cast %92 : vector<1x49xf32> to vector<1x1x49xf32>
    %cst_57 = arith.constant dense<0x7F800000> : vector<1x1xf32>
    %94 = vector.multi_reduction <minimumf>, %93, %cst_57 [2] : vector<1x1x49xf32> to vector<1x1xf32>
    %95 = vector.shape_cast %94 : vector<1x1xf32> to vector<1x1x1xf32>
    %cst_58 = arith.constant dense<0xFF800000> : vector<1x1xf32>
    %96 = vector.multi_reduction <maximumf>, %93, %cst_58 [2] : vector<1x1x49xf32> to vector<1x1xf32>
    %97 = vector.shape_cast %96 : vector<1x1xf32> to vector<1x1x1xf32>
    %98 = arith.subf %97, %95 : vector<1x1x1xf32>
    %99 = vector.broadcast %95 : vector<1x1x1xf32> to vector<1x1x49xf32>
    %100 = arith.subf %93, %99 : vector<1x1x49xf32>
    %cst_59 = arith.constant 0.000000e+00 : f32
    %101 = vector.broadcast %cst_59 : f32 to vector<1x1x1xf32>
    %102 = arith.cmpf one, %98, %101 : vector<1x1x1xf32>
    %cst_60 = arith.constant 1.000000e+00 : f32
    %103 = vector.broadcast %cst_60 : f32 to vector<1x1x1xf32>
    %104 = arith.select %102, %98, %103 : vector<1x1x1xi1>, vector<1x1x1xf32>
    %105 = vector.broadcast %104 : vector<1x1x1xf32> to vector<1x1x49xf32>
    %106 = arith.divf %100, %105 : vector<1x1x49xf32>
    %c0_61 = arith.constant 0 : index
    %c2 = arith.constant 2 : index
    %c0_62 = arith.constant 0 : index
    %107 = vector.load %arg7[%c0_61, %c2, %c0_62] : memref<1x3x49xf32, #tpu.memory_space<vmem>>, vector<1x1x49xf32>
    tpu.vector_store %arg7[%c0_61, %c2, %c0_62], %106 {strides = array<i32>} : memref<1x3x49xf32, #tpu.memory_space<vmem>>, vector<1x1x49xf32>,
    return
  }
  func.func @transform_0(%arg0: i32) -> i32 {
    %c0_i32 = arith.constant 0 : i32
    %c0_i32_0 = arith.constant 0 : i32
    return %c0_i32 : i32
  }
  func.func @transform_1(%arg0: i32) -> (i32, i32, i32) {
    %c0_i32 = arith.constant 0 : i32
    %c0_i32_0 = arith.constant 0 : i32
    %c0_i32_1 = arith.constant 0 : i32
    return %arg0, %c0_i32, %c0_i32_0 : i32, i32, i32
  }
  func.func @transform_2(%arg0: i32) -> (i32, i32, i32) {
    %c0_i32 = arith.constant 0 : i32
    %c0_i32_0 = arith.constant 0 : i32
    %c0_i32_1 = arith.constant 0 : i32
    return %arg0, %c0_i32, %c0_i32_0 : i32, i32, i32
  }
  func.func @transform_3(%arg0: i32) -> (i32, i32) {
    %c0_i32 = arith.constant 0 : i32
    %c0_i32_0 = arith.constant 0 : i32
    %c0_i32_1 = arith.constant 0 : i32
    return %c0_i32, %c0_i32_0 : i32, i32
  }
  func.func @transform_4(%arg0: i32) -> (i32, i32) {
    %c0_i32 = arith.constant 0 : i32
    %c0_i32_0 = arith.constant 0 : i32
    %c0_i32_1 = arith.constant 0 : i32
    return %c0_i32, %c0_i32_0 : i32, i32
  }
  func.func @transform_5(%arg0: i32) -> (i32, i32, i32) {
    %c0_i32 = arith.constant 0 : i32
    %c0_i32_0 = arith.constant 0 : i32
    %c0_i32_1 = arith.constant 0 : i32
    return %arg0, %c0_i32, %c0_i32_0 : i32, i32, i32
  }
  func.func @transform_6(%arg0: i32) -> (i32, i32, i32) {
    %c0_i32 = arith.constant 0 : i32
    %c0_i32_0 = arith.constant 0 : i32
    %c0_i32_1 = arith.constant 0 : i32
    return %arg0, %c0_i32, %c0_i32_0 : i32, i32, i32
  }
}

</mosaic_0001>

<bundles_post_ra>
// kernel: tpu_custom_call.1
= control target key start
LH: loop header
LB: loop body
LE: loop exit
PB: predicated region body
PF: predicated region fallthrough
CT: control target
= control target key end

     0   :  { %12 = vsyncpa [#allocation4], 0  ;;  %s1628_s21 = smov 0   ;;  %s2335_s0 = inlined_call_operand.vmem [shape: f32[3], index: 0, kind: input, shape index: {}]   ;;  %s2336_s1 = inlined_call_operand.vmem [shape: f32[2,16,1], index: 1, kind: input, shape index: {}]   ;;  %s2337_s2 = inlined_call_operand.vmem [shape: f32[2,2048,49], index: 2, kind: input, shape index: {}]   ;;  %s2338_s3 = inlined_call_operand.vmem [shape: f32[48,2048], index: 3, kind: input, shape index: {}]   ;;  %s2339_s4 = inlined_call_operand.vmem [shape: f32[48,1], index: 4, kind: input, shape index: {}]   ;;  %s2340_s5 = inlined_call_operand.vmem [shape: f32[2,48,1], index: 5, kind: output, shape index: {0}]   ;;  %s2341_s6 = inlined_call_operand.vmem [shape: f32[2,3,49], index: 6, kind: output, shape index: {1}]  }
   0x1 LB: > { %s1514_s22 = sadd.s32 4294967295, %s1588_s21   ;;  %p1516_p0 = scmp.ge.s32.totalorder %s1588_s21, 1  ;;  %s1588_s21 = sphi %s1628_s21, %s18_s21  }
   0x2   : > { %p190_p1 = scmp.lt.s32.totalorder %s1588_s21, 3  ;;  %s202_s25 = sshll.u32 %s2335_s0, 4  ;;  %s203_s25 = int_to_ptr.vmem [resolvable:$true] %s202_s25 }
   0x3   : > { %p1543_p3 = scmp.eq.s32.totalorder %s1514_s22, 0  ;;  %s1590_s26 = smov [#allocation3]  }
   0x4   : > { %p191_p2 = pnand %p1516_p0, %p190_p1 }
   0x6   : > { %p1539_p4 = pneg %p191_p2  ;;  %237 = sbr.rel (%p191_p2) target bundleno = 852 (0x354), region = 40 }
   0x8   : > { %p1540_p5 = pnand %p1543_p3, %p1539_p4 }
   0xa   : > { %1542 = dma.vmem_to_smem (!%p1540_p5), %s203_s25, 16, %s1590_s26, [#allocation4]  }
   0xb   : > { %1583 = dma.done.wait (%p1543_p3), [#allocation4], 16  }
   0xc   : > { %1585 = vsyncadd (%p1543_p3), [#allocation4], 4294967280 }
   0xd   : > { %244 = sfence }
   0xe   : > { %p278_p6 = scmp.lt.s32.totalorder %s1514_s22, 1  ;;  %v297_v62 = vld [vmem:[%s2338_s3] sm:$0xff]  ;;  %v299_v63 = vld [vmem:[%s2338_s3 + $0x10] sm:$0xff]  ;;  %vm1209_vm0 = vcmask 400384   ;;  %s1283_s11 = sld [smem:[#allocation3]]  ;;  %vm1281_vm6 = vcmask 393216  }
   0xf   : > { %vm1232_vm9 = vcmask 7168   ;;  %s1528_s23 = sld [smem:[#allocation3 + $0x1]] }
  0x10   : > { %s2343_s22 = smov (!%p278_p6, %s1514_s22), 1 }
  0x11   : > { %s1533_s27 = sshll.u32 %s2343_s22, 11  ;;  %s1532_s15 = sshll.u32 %s2343_s22, 4 }
  0x12   : > { %s1645_s30 = scalar_lea.vmem %s2337_s2, %s1533_s27  ;;  %s282_s19 = scalar_lea.vmem %s2336_s1, %s1532_s15 }
  0x13   : > { %v408_v0 = vld [vmem:[%s1645_s30 + $0x78] sm:$0xff]  ;;  %v407_v2 = vld [vmem:[%s1645_s30 + $0x70] sm:$0xff]  ;;  %v406_v6 = vld [vmem:[%s1645_s30 + $0x68] sm:$0xff]  ;;  %s1526_s12 = sshll.u32 %s2343_s22, 2  ;;  %s1534_s16 = smul.u32 48, %s2343_s22 }
  0x14   : > { %v440_v1 = vld [vmem:[%s1645_s30 + $0x178] sm:$0xff]  ;;  %649 = vmatpush.msra.mxu0 %v408_v0  ;;  %v439_v4 = vld [vmem:[%s1645_s30 + $0x170] sm:$0xff]  ;;  %v438_v8 = vld [vmem:[%s1645_s30 + $0x168] sm:$0xff]  ;;  %s2257_s15 = scalar_lea.vmem %s2341_s6, %s1526_s12 }
  0x15   : > { %719 = vmatpush.msra.mxu2 %v440_v1  ;;  %v424_v3 = vld [vmem:[%s1645_s30 + $0xf8] sm:$0xff]  ;;  %v423_v7 = vld [vmem:[%s1645_s30 + $0xf0] sm:$0xff]  ;;  %v422_v10 = vld [vmem:[%s1645_s30 + $0xe8] sm:$0xff]  ;;  %s2285_s20 = scalar_lea.vmem %s2340_s5, %s1534_s16 }
  0x16   : > { %v456_v5 = vld [vmem:[%s1645_s30 + $0x1f8] sm:$0xff]  ;;  %684 = vmatpush.msra.mxu1 %v424_v3  ;;  %650 = vmatpush.msra.mxu0 %v407_v2  ;;  %v455_v9 = vld [vmem:[%s1645_s30 + $0x1f0] sm:$0xff]  ;;  %v405_v11 = vld [vmem:[%s1645_s30 + $0x60] sm:$0xff] }
  0x17   : > { %754 = vmatpush.msra.mxu3 %v456_v5  ;;  %720 = vmatpush.msra.mxu2 %v439_v4  ;;  %v437_v12 = vld [vmem:[%s1645_s30 + $0x160] sm:$0xff]  ;;  %v454_v13 = vld [vmem:[%s1645_s30 + $0x1e8] sm:$0xff]  ;;  %v404_v16 = vld [vmem:[%s1645_s30 + $0x58] sm:$0xff] }
  0x18   : > { %685 = vmatpush.msra.mxu1 %v423_v7  ;;  %651 = vmatpush.msra.mxu0 %v406_v6  ;;  %v421_v14 = vld [vmem:[%s1645_s30 + $0xe0] sm:$0xff]  ;;  %v436_v17 = vld [vmem:[%s1645_s30 + $0x158] sm:$0xff]  ;;  %v403_v20 = vld [vmem:[%s1645_s30 + $0x50] sm:$0xff] }
  0x19   : > { %755 = vmatpush.msra.mxu3 %v455_v9  ;;  %721 = vmatpush.msra.mxu2 %v438_v8  ;;  %v453_v15 = vld [vmem:[%s1645_s30 + $0x1e0] sm:$0xff]  ;;  %v420_v18 = vld [vmem:[%s1645_s30 + $0xd8] sm:$0xff]  ;;  %v435_v21 = vld [vmem:[%s1645_s30 + $0x150] sm:$0xff] }
  0x1a   : > { %686 = vmatpush.msra.mxu1 %v422_v10  ;;  %652 = vmatpush.msra.mxu0 %v405_v11  ;;  %v452_v19 = vld [vmem:[%s1645_s30 + $0x1d8] sm:$0xff]  ;;  %v419_v22 = vld [vmem:[%s1645_s30 + $0xd0] sm:$0xff]  ;;  %v402_v24 = vld [vmem:[%s1645_s30 + $0x48] sm:$0xff] }
  0x1b   : > { %756 = vmatpush.msra.mxu3 %v454_v13  ;;  %722 = vmatpush.msra.mxu2 %v437_v12  ;;  %v451_v23 = vld [vmem:[%s1645_s30 + $0x1d0] sm:$0xff]  ;;  %v434_v25 = vld [vmem:[%s1645_s30 + $0x148] sm:$0xff]  ;;  %v401_v28 = vld [vmem:[%s1645_s30 + $0x40] sm:$0xff] }
  0x1c   : > { %687 = vmatpush.msra.mxu1 %v421_v14  ;;  %653 = vmatpush.msra.mxu0 %v404_v16  ;;  %v418_v26 = vld [vmem:[%s1645_s30 + $0xc8] sm:$0xff]  ;;  %v433_v29 = vld [vmem:[%s1645_s30 + $0x140] sm:$0xff]  ;;  %v400_v32 = vld [vmem:[%s1645_s30 + $0x38] sm:$0xff] }
  0x1d   : > { %757 = vmatpush.msra.mxu3 %v453_v15  ;;  %723 = vmatpush.msra.mxu2 %v436_v17  ;;  %v450_v27 = vld [vmem:[%s1645_s30 + $0x1c8] sm:$0xff]  ;;  %v417_v30 = vld [vmem:[%s1645_s30 + $0xc0] sm:$0xff]  ;;  %v432_v33 = vld [vmem:[%s1645_s30 + $0x138] sm:$0xff] }
  0x1e   : > { %688 = vmatpush.msra.mxu1 %v420_v18  ;;  %654 = vmatpush.msra.mxu0 %v403_v20  ;;  %v449_v31 = vld [vmem:[%s1645_s30 + $0x1c0] sm:$0xff]  ;;  %v416_v34 = vld [vmem:[%s1645_s30 + $0xb8] sm:$0xff]  ;;  %v399_v36 = vld [vmem:[%s1645_s30 + $0x30] sm:$0xff] }
  0x1f   : > { %758 = vmatpush.msra.mxu3 %v452_v19  ;;  %724 = vmatpush.msra.mxu2 %v435_v21  ;;  %v448_v35 = vld [vmem:[%s1645_s30 + $0x1b8] sm:$0xff]  ;;  %v431_v37 = vld [vmem:[%s1645_s30 + $0x130] sm:$0xff]  ;;  %v398_v40 = vld [vmem:[%s1645_s30 + $0x28] sm:$0xff] }
  0x20   : > { %689 = vmatpush.msra.mxu1 %v419_v22  ;;  %655 = vmatpush.msra.mxu0 %v402_v24  ;;  %v415_v38 = vld [vmem:[%s1645_s30 + $0xb0] sm:$0xff]  ;;  %v430_v41 = vld [vmem:[%s1645_s30 + $0x128] sm:$0xff]  ;;  %v397_v44 = vld [vmem:[%s1645_s30 + $0x20] sm:$0xff] }
  0x21   : > { %759 = vmatpush.msra.mxu3 %v451_v23  ;;  %725 = vmatpush.msra.mxu2 %v434_v25  ;;  %v447_v39 = vld [vmem:[%s1645_s30 + $0x1b0] sm:$0xff]  ;;  %v414_v42 = vld [vmem:[%s1645_s30 + $0xa8] sm:$0xff]  ;;  %v429_v45 = vld [vmem:[%s1645_s30 + $0x120] sm:$0xff] }
  0x22   : > { %690 = vmatpush.msra.mxu1 %v418_v26  ;;  %656 = vmatpush.msra.mxu0 %v401_v28  ;;  %v446_v43 = vld [vmem:[%s1645_s30 + $0x1a8] sm:$0xff]  ;;  %v413_v46 = vld [vmem:[%s1645_s30 + $0xa0] sm:$0xff]  ;;  %v396_v48 = vld [vmem:[%s1645_s30 + $0x18] sm:$0xff] }
  0x23   : > { %760 = vmatpush.msra.mxu3 %v450_v27  ;;  %726 = vmatpush.msra.mxu2 %v433_v29  ;;  %v445_v47 = vld [vmem:[%s1645_s30 + $0x1a0] sm:$0xff]  ;;  %v428_v49 = vld [vmem:[%s1645_s30 + $0x118] sm:$0xff]  ;;  %v395_v52 = vld [vmem:[%s1645_s30 + $0x10] sm:$0xff] }
  0x24   : > { %691 = vmatpush.msra.mxu1 %v417_v30  ;;  %657 = vmatpush.msra.mxu0 %v400_v32  ;;  %v412_v50 = vld [vmem:[%s1645_s30 + $0x98] sm:$0xff]  ;;  %v427_v53 = vld [vmem:[%s1645_s30 + $0x110] sm:$0xff]  ;;  %v394_v56 = vld [vmem:[%s1645_s30 + $0x8] sm:$0xff] }
  0x25   : > { %761 = vmatpush.msra.mxu3 %v449_v31  ;;  %727 = vmatpush.msra.mxu2 %v432_v33  ;;  %v444_v51 = vld [vmem:[%s1645_s30 + $0x198] sm:$0xff]  ;;  %v411_v54 = vld [vmem:[%s1645_s30 + $0x90] sm:$0xff]  ;;  %v426_v57 = vld [vmem:[%s1645_s30 + $0x108] sm:$0xff] }
  0x26   : > { %692 = vmatpush.msra.mxu1 %v416_v34  ;;  %658 = vmatpush.msra.mxu0 %v399_v36  ;;  %v443_v55 = vld [vmem:[%s1645_s30 + $0x190] sm:$0xff]  ;;  %v410_v58 = vld [vmem:[%s1645_s30 + $0x88] sm:$0xff]  ;;  %v393_v60 = vld [vmem:[%s1645_s30] sm:$0xff] }
  0x27   : > { %762 = vmatpush.msra.mxu3 %v448_v35  ;;  %728 = vmatpush.msra.mxu2 %v431_v37  ;;  %v442_v59 = vld [vmem:[%s1645_s30 + $0x188] sm:$0xff]  ;;  %v425_v61 = vld [vmem:[%s1645_s30 + $0x100] sm:$0xff]  ;;  %v504_v0 = vld [vmem:[%s1645_s30 + $0x378] sm:$0xff] }
  0x28   : > { %693 = vmatpush.msra.mxu1 %v415_v38  ;;  %659 = vmatpush.msra.mxu0 %v398_v40  ;;  %v409_v1 = vld [vmem:[%s1645_s30 + $0x80] sm:$0xff]  ;;  %v298_v3 = vld [vmem:[%s2338_s3 + $0x8] sm:$0xff]  ;;  %v300_v4 = vld [vmem:[%s2338_s3 + $0x18] sm:$0xff] }
  0x29   : > { %763 = vmatpush.msra.mxu3 %v447_v39  ;;  %729 = vmatpush.msra.mxu2 %v430_v41  ;;  %v441_v2 = vld [vmem:[%s1645_s30 + $0x180] sm:$0xff]  ;;  %v472_v5 = vld [vmem:[%s1645_s30 + $0x278] sm:$0xff]  ;;  %v503_v7 = vld [vmem:[%s1645_s30 + $0x370] sm:$0xff] }
  0x2a   : > { %694 = vmatpush.msra.mxu1 %v414_v42  ;;  %660 = vmatpush.msra.mxu0 %v397_v44  ;;  %v520_v6 = vld [vmem:[%s1645_s30 + $0x3f8] sm:$0xff]  ;;  %v471_v9 = vld [vmem:[%s1645_s30 + $0x270] sm:$0xff]  ;;  %v502_v11 = vld [vmem:[%s1645_s30 + $0x368] sm:$0xff] }
  0x2b   : > { %764 = vmatpush.msra.mxu3 %v446_v43  ;;  %730 = vmatpush.msra.mxu2 %v429_v45  ;;  %v488_v8 = vld [vmem:[%s1645_s30 + $0x2f8] sm:$0xff]  ;;  %v519_v10 = vld [vmem:[%s1645_s30 + $0x3f0] sm:$0xff]  ;;  %v470_v13 = vld [vmem:[%s1645_s30 + $0x268] sm:$0xff] }
  0x2c   : > { %695 = vmatpush.msra.mxu1 %v413_v46  ;;  %661 = vmatpush.msra.mxu0 %v396_v48  ;;  %v487_v12 = vld [vmem:[%s1645_s30 + $0x2f0] sm:$0xff]  ;;  %v313_v14 = vld [vmem:[%s2338_s3 + $0x80] sm:$0xff]  ;;  %v518_v16 = vld [vmem:[%s1645_s30 + $0x3e8] sm:$0xff] }
  0x2d   : > { %765 = vmatpush.msra.mxu3 %v445_v47  ;;  %731 = vmatpush.msra.mxu2 %v428_v49  ;;  %v315_v15 = vld [vmem:[%s2338_s3 + $0x90] sm:$0xff]  ;;  %v501_v17 = vld [vmem:[%s1645_s30 + $0x360] sm:$0xff]  ;;  %v314_v18 = vld [vmem:[%s2338_s3 + $0x88] sm:$0xff] }
  0x2e   : > { %696 = vmatpush.msra.mxu1 %v412_v50  ;;  %662 = vmatpush.msra.mxu0 %v395_v52  ;;  %v469_v19 = vld [vmem:[%s1645_s30 + $0x260] sm:$0xff]  ;;  %v316_v20 = vld [vmem:[%s2338_s3 + $0x98] sm:$0xff]  ;;  %v486_v21 = vld [vmem:[%s1645_s30 + $0x2e8] sm:$0xff] }
  0x2f   : > { %766 = vmatpush.msra.mxu3 %v444_v51  ;;  %732 = vmatpush.msra.mxu2 %v427_v53  ;;  %v517_v22 = vld [vmem:[%s1645_s30 + $0x3e0] sm:$0xff]  ;;  %v500_v23 = vld [vmem:[%s1645_s30 + $0x358] sm:$0xff]  ;;  %v499_v27 = vld [vmem:[%s1645_s30 + $0x350] sm:$0xff] }
  0x30   : > { %697 = vmatpush.msra.mxu1 %v411_v54  ;;  %663 = vmatpush.msra.mxu0 %v394_v56  ;;  %v485_v24 = vld [vmem:[%s1645_s30 + $0x2e0] sm:$0xff]  ;;  %v468_v25 = vld [vmem:[%s1645_s30 + $0x258] sm:$0xff]  ;;  %v467_v29 = vld [vmem:[%s1645_s30 + $0x250] sm:$0xff] }
  0x31   : > { %767 = vmatpush.msra.mxu3 %v443_v55  ;;  %733 = vmatpush.msra.mxu2 %v426_v57  ;;  %v516_v26 = vld [vmem:[%s1645_s30 + $0x3d8] sm:$0xff]  ;;  %v329_v30 = vld [vmem:[%s2338_s3 + $0x100] sm:$0xff]  ;;  %v331_v31 = vld [vmem:[%s2338_s3 + $0x110] sm:$0xff] }
  0x32   : > { %698 = vmatpush.msra.mxu1 %v410_v58  ;;  %664 = vmatpush.msra.mxu0 %v393_v60  ;;  %v484_v28 = vld [vmem:[%s1645_s30 + $0x2d8] sm:$0xff]  ;;  %v515_v32 = vld [vmem:[%s1645_s30 + $0x3d0] sm:$0xff]  ;;  %v498_v33 = vld [vmem:[%s1645_s30 + $0x348] sm:$0xff] }
  0x33   : > { %768 = vmatpush.msra.mxu3 %v442_v59  ;;  %734 = vmatpush.msra.mxu2 %v425_v61  ;;  %v330_v34 = vld [vmem:[%s2338_s3 + $0x108] sm:$0xff]  ;;  %v332_v36 = vld [vmem:[%s2338_s3 + $0x118] sm:$0xff]  ;;  %v483_v37 = vld [vmem:[%s1645_s30 + $0x2d0] sm:$0xff] }
  0x34   : > { %665 = vmatmul.f32.vlgmr.msra.gmra.mxu0 %v297_v62  ;;  %735 = vmatmul.f32.vlgmr.msra.gmra.mxu2 %v299_v63  ;;  %v466_v35 = vld [vmem:[%s1645_s30 + $0x248] sm:$0xff]  ;;  %v497_v39 = vld [vmem:[%s1645_s30 + $0x340] sm:$0xff]  ;;  %v496_v43 = vld [vmem:[%s1645_s30 + $0x338] sm:$0xff] }
  0x35   : > { %859 = vmatpush.msrb.mxu2 %v504_v0  ;;  %699 = vmatpush.msra.mxu1 %v409_v1  ;;  %v514_v38 = vld [vmem:[%s1645_s30 + $0x3c8] sm:$0xff]  ;;  %v465_v41 = vld [vmem:[%s1645_s30 + $0x240] sm:$0xff]  ;;  %v464_v45 = vld [vmem:[%s1645_s30 + $0x238] sm:$0xff] }
  0x36   : > { %769 = vmatpush.msra.mxu3 %v441_v2  ;;  %700 = vmatmul.f32.vlgmr.msra.gmra.mxu1 %v298_v3  ;;  %v482_v40 = vld [vmem:[%s1645_s30 + $0x2c8] sm:$0xff]  ;;  %v513_v42 = vld [vmem:[%s1645_s30 + $0x3c0] sm:$0xff]  ;;  %v347_v47 = vld [vmem:[%s2338_s3 + $0x190] sm:$0xff] }
  0x37   : > { %770 = vmatmul.f32.vlgmr.msra.gmra.mxu3 %v300_v4  ;;  %789 = vmatpush.msrb.mxu0 %v472_v5  ;;  %v481_v44 = vld [vmem:[%s1645_s30 + $0x2c0] sm:$0xff]  ;;  %v512_v48 = vld [vmem:[%s1645_s30 + $0x3b8] sm:$0xff]  ;;  %v495_v49 = vld [vmem:[%s1645_s30 + $0x330] sm:$0xff] }
  0x38   : > { %894 = vmatpush.msrb.mxu3 %v520_v6  ;;  %860 = vmatpush.msrb.mxu2 %v503_v7  ;;  %v345_v46 = vld [vmem:[%s2338_s3 + $0x180] sm:$0xff]  ;;  %v346_v50 = vld [vmem:[%s2338_s3 + $0x188] sm:$0xff]  ;;  %v463_v51 = vld [vmem:[%s1645_s30 + $0x230] sm:$0xff] }
  0x39   : > { %824 = vmatpush.msrb.mxu1 %v488_v8  ;;  %790 = vmatpush.msrb.mxu0 %v471_v9  ;;  %v348_v52 = vld [vmem:[%s2338_s3 + $0x198] sm:$0xff]  ;;  %v511_v54 = vld [vmem:[%s1645_s30 + $0x3b0] sm:$0xff]  ;;  %v494_v55 = vld [vmem:[%s1645_s30 + $0x328] sm:$0xff] }
  0x3a   : > { %895 = vmatpush.msrb.mxu3 %v519_v10  ;;  %861 = vmatpush.msrb.mxu2 %v502_v11  ;;  %v480_v53 = vld [vmem:[%s1645_s30 + $0x2b8] sm:$0xff]  ;;  %v479_v56 = vld [vmem:[%s1645_s30 + $0x2b0] sm:$0xff]  ;;  %v462_v57 = vld [vmem:[%s1645_s30 + $0x228] sm:$0xff] }
  0x3b   : > { %825 = vmatpush.msrb.mxu1 %v487_v12  ;;  %791 = vmatpush.msrb.mxu0 %v470_v13  ;;  %v510_v58 = vld [vmem:[%s1645_s30 + $0x3a8] sm:$0xff]  ;;  %v493_v59 = vld [vmem:[%s1645_s30 + $0x320] sm:$0xff]  ;;  %v363_v63 = vld [vmem:[%s2338_s3 + $0x210] sm:$0xff] }
  0x3c   : > { %668 = vmatmul.f32.gmra.mxu0 %v313_v14  ;;  %738 = vmatmul.f32.gmra.mxu2 %v315_v15  ;;  %v478_v60 = vld [vmem:[%s1645_s30 + $0x2a8] sm:$0xff]  ;;  %v461_v61 = vld [vmem:[%s1645_s30 + $0x220] sm:$0xff]  ;;  %v492_v1 = vld [vmem:[%s1645_s30 + $0x318] sm:$0xff] }
  0x3d   : > { %896 = vmatpush.msrb.mxu3 %v518_v16  ;;  %862 = vmatpush.msrb.mxu2 %v501_v17  ;;  %v361_v62 = vld [vmem:[%s2338_s3 + $0x200] sm:$0xff]  ;;  %v362_v2 = vld [vmem:[%s2338_s3 + $0x208] sm:$0xff]  ;;  %v460_v3 = vld [vmem:[%s1645_s30 + $0x218] sm:$0xff] }
  0x3e   : > { %703 = vmatmul.f32.gmra.mxu1 %v314_v18  ;;  %792 = vmatpush.msrb.mxu0 %v469_v19  ;;  %v509_v0 = vld [vmem:[%s1645_s30 + $0x3a0] sm:$0xff]  ;;  %v364_v4 = vld [vmem:[%s2338_s3 + $0x218] sm:$0xff]  ;;  %v491_v7 = vld [vmem:[%s1645_s30 + $0x310] sm:$0xff] }
  0x3f   : > { %773 = vmatmul.f32.gmra.mxu3 %v316_v20  ;;  %826 = vmatpush.msrb.mxu1 %v486_v21  ;;  %v477_v5 = vld [vmem:[%s1645_s30 + $0x2a0] sm:$0xff]  ;;  %v508_v6 = vld [vmem:[%s1645_s30 + $0x398] sm:$0xff]  ;;  %v459_v9 = vld [vmem:[%s1645_s30 + $0x210] sm:$0xff] }
  0x40   : > { %897 = vmatpush.msrb.mxu3 %v517_v22  ;;  %863 = vmatpush.msrb.mxu2 %v500_v23  ;;  %v476_v8 = vld [vmem:[%s1645_s30 + $0x298] sm:$0xff]  ;;  %v507_v10 = vld [vmem:[%s1645_s30 + $0x390] sm:$0xff]  ;;  %v490_v11 = vld [vmem:[%s1645_s30 + $0x308] sm:$0xff] }
  0x41   : > { %827 = vmatpush.msrb.mxu1 %v485_v24  ;;  %793 = vmatpush.msrb.mxu0 %v468_v25  ;;  %v475_v12 = vld [vmem:[%s1645_s30 + $0x290] sm:$0xff]  ;;  %v458_v13 = vld [vmem:[%s1645_s30 + $0x208] sm:$0xff]  ;;  %v377_v14 = vld [vmem:[%s2338_s3 + $0x280] sm:$0xff] }
  0x42   : > { %898 = vmatpush.msrb.mxu3 %v516_v26  ;;  %864 = vmatpush.msrb.mxu2 %v499_v27  ;;  %v379_v15 = vld [vmem:[%s2338_s3 + $0x290] sm:$0xff]  ;;  %v506_v16 = vld [vmem:[%s1645_s30 + $0x388] sm:$0xff]  ;;  %v489_v17 = vld [vmem:[%s1645_s30 + $0x300] sm:$0xff] }
  0x43   : > { %828 = vmatpush.msrb.mxu1 %v484_v28  ;;  %794 = vmatpush.msrb.mxu0 %v467_v29  ;;  %v378_v18 = vld [vmem:[%s2338_s3 + $0x288] sm:$0xff]  ;;  %v457_v19 = vld [vmem:[%s1645_s30 + $0x200] sm:$0xff]  ;;  %v380_v20 = vld [vmem:[%s2338_s3 + $0x298] sm:$0xff] }
  0x44   : > { %671 = vmatmul.f32.gmra.mxu0 %v329_v30  ;;  %741 = vmatmul.f32.gmra.mxu2 %v331_v31  ;;  %v474_v21 = vld [vmem:[%s1645_s30 + $0x288] sm:$0xff]  ;;  %v505_v22 = vld [vmem:[%s1645_s30 + $0x380] sm:$0xff]  ;;  %v568_v23 = vld [vmem:[%s1645_s30 + $0x578] sm:$0xff] }
  0x45   : > { %899 = vmatpush.msrb.mxu3 %v515_v32  ;;  %865 = vmatpush.msrb.mxu2 %v498_v33  ;;  %v473_v24 = vld [vmem:[%s1645_s30 + $0x280] sm:$0xff]  ;;  %v536_v25 = vld [vmem:[%s1645_s30 + $0x478] sm:$0xff]  ;;  %v567_v27 = vld [vmem:[%s1645_s30 + $0x570] sm:$0xff] }
  0x46   : > { %706 = vmatmul.f32.gmra.mxu1 %v330_v34  ;;  %795 = vmatpush.msrb.mxu0 %v466_v35  ;;  %v584_v26 = vld [vmem:[%s1645_s30 + $0x5f8] sm:$0xff]  ;;  %v535_v29 = vld [vmem:[%s1645_s30 + $0x470] sm:$0xff]  ;;  %v301_v30 = vld [vmem:[%s2338_s3 + $0x20] sm:$0xff] }
  0x47   : > { %776 = vmatmul.f32.gmra.mxu3 %v332_v36  ;;  %829 = vmatpush.msrb.mxu1 %v483_v37  ;;  %v552_v28 = vld [vmem:[%s1645_s30 + $0x4f8] sm:$0xff]  ;;  %v303_v31 = vld [vmem:[%s2338_s3 + $0x30] sm:$0xff]  ;;  %v566_v33 = vld [vmem:[%s1645_s30 + $0x568] sm:$0xff] }
  0x48   : > { %900 = vmatpush.msrb.mxu3 %v514_v38  ;;  %866 = vmatpush.msrb.mxu2 %v497_v39  ;;  %v583_v32 = vld [vmem:[%s1645_s30 + $0x5f0] sm:$0xff]  ;;  %v302_v34 = vld [vmem:[%s2338_s3 + $0x28] sm:$0xff]  ;;  %v304_v36 = vld [vmem:[%s2338_s3 + $0x38] sm:$0xff] }
  0x49   : > { %830 = vmatpush.msrb.mxu1 %v482_v40  ;;  %796 = vmatpush.msrb.mxu0 %v465_v41  ;;  %v534_v35 = vld [vmem:[%s1645_s30 + $0x468] sm:$0xff]  ;;  %v551_v37 = vld [vmem:[%s1645_s30 + $0x4f0] sm:$0xff]  ;;  %v565_v39 = vld [vmem:[%s1645_s30 + $0x560] sm:$0xff] }
  0x4a   : > { %901 = vmatpush.msrb.mxu3 %v513_v42  ;;  %867 = vmatpush.msrb.mxu2 %v496_v43  ;;  %v582_v38 = vld [vmem:[%s1645_s30 + $0x5e8] sm:$0xff]  ;;  %v533_v41 = vld [vmem:[%s1645_s30 + $0x460] sm:$0xff]  ;;  %v564_v43 = vld [vmem:[%s1645_s30 + $0x558] sm:$0xff] }
  0x4b   : > { %831 = vmatpush.msrb.mxu1 %v481_v44  ;;  %797 = vmatpush.msrb.mxu0 %v464_v45  ;;  %v550_v40 = vld [vmem:[%s1645_s30 + $0x4e8] sm:$0xff]  ;;  %v581_v42 = vld [vmem:[%s1645_s30 + $0x5e0] sm:$0xff]  ;;  %v532_v45 = vld [vmem:[%s1645_s30 + $0x458] sm:$0xff] }
  0x4c   : > { %674 = vmatmul.f32.gmra.mxu0 %v345_v46  ;;  %744 = vmatmul.f32.gmra.mxu2 %v347_v47  ;;  %v549_v44 = vld [vmem:[%s1645_s30 + $0x4e0] sm:$0xff]  ;;  %v319_v47 = vld [vmem:[%s2338_s3 + $0xb0] sm:$0xff] }
  0x4d   : > { %902 = vmatpush.msrb.mxu3 %v512_v48  ;;  %868 = vmatpush.msrb.mxu2 %v495_v49  ;;  %v317_v46 = vld [vmem:[%s2338_s3 + $0xa0] sm:$0xff]  ;;  %v580_v48 = vld [vmem:[%s1645_s30 + $0x5d8] sm:$0xff]  ;;  %v563_v49 = vld [vmem:[%s1645_s30 + $0x550] sm:$0xff] }
  0x4e   : > { %709 = vmatmul.f32.gmra.mxu1 %v346_v50  ;;  %798 = vmatpush.msrb.mxu0 %v463_v51  ;;  %v318_v50 = vld [vmem:[%s2338_s3 + $0xa8] sm:$0xff]  ;;  %v531_v51 = vld [vmem:[%s1645_s30 + $0x450] sm:$0xff] }
  0x4f   : > { %779 = vmatmul.f32.gmra.mxu3 %v348_v52  ;;  %832 = vmatpush.msrb.mxu1 %v480_v53  ;;  %v320_v52 = vld [vmem:[%s2338_s3 + $0xb8] sm:$0xff] }
  0x50   : > { %903 = vmatpush.msrb.mxu3 %v511_v54  ;;  %869 = vmatpush.msrb.mxu2 %v494_v55  ;;  %v548_v53 = vld [vmem:[%s1645_s30 + $0x4d8] sm:$0xff]  ;;  %v579_v54 = vld [vmem:[%s1645_s30 + $0x5d0] sm:$0xff]  ;;  %v562_v55 = vld [vmem:[%s1645_s30 + $0x548] sm:$0xff] }
  0x51   : > { %833 = vmatpush.msrb.mxu1 %v479_v56  ;;  %799 = vmatpush.msrb.mxu0 %v462_v57  ;;  %v547_v56 = vld [vmem:[%s1645_s30 + $0x4d0] sm:$0xff]  ;;  %v530_v57 = vld [vmem:[%s1645_s30 + $0x448] sm:$0xff] }
  0x52   : > { %904 = vmatpush.msrb.mxu3 %v510_v58  ;;  %870 = vmatpush.msrb.mxu2 %v493_v59  ;;  %v578_v58 = vld [vmem:[%s1645_s30 + $0x5c8] sm:$0xff]  ;;  %v561_v59 = vld [vmem:[%s1645_s30 + $0x540] sm:$0xff] }
  0x53   : > { %834 = vmatpush.msrb.mxu1 %v478_v60  ;;  %800 = vmatpush.msrb.mxu0 %v461_v61  ;;  %v546_v60 = vld [vmem:[%s1645_s30 + $0x4c8] sm:$0xff]  ;;  %v529_v61 = vld [vmem:[%s1645_s30 + $0x440] sm:$0xff] }
  0x54   : > { %677 = vmatmul.f32.gmra.mxu0 %v361_v62  ;;  %747 = vmatmul.f32.gmra.mxu2 %v363_v63  ;;  %v333_v62 = vld [vmem:[%s2338_s3 + $0x120] sm:$0xff]  ;;  %v335_v63 = vld [vmem:[%s2338_s3 + $0x130] sm:$0xff] }
  0x55   : > { %905 = vmatpush.msrb.mxu3 %v509_v0  ;;  %871 = vmatpush.msrb.mxu2 %v492_v1  ;;  %v577_v0 = vld [vmem:[%s1645_s30 + $0x5c0] sm:$0xff]  ;;  %v560_v1 = vld [vmem:[%s1645_s30 + $0x538] sm:$0xff] }
  0x56   : > { %712 = vmatmul.f32.gmra.mxu1 %v362_v2  ;;  %801 = vmatpush.msrb.mxu0 %v460_v3  ;;  %v334_v2 = vld [vmem:[%s2338_s3 + $0x128] sm:$0xff]  ;;  %v528_v3 = vld [vmem:[%s1645_s30 + $0x438] sm:$0xff] }
  0x57   : > { %782 = vmatmul.f32.gmra.mxu3 %v364_v4  ;;  %835 = vmatpush.msrb.mxu1 %v477_v5  ;;  %v336_v4 = vld [vmem:[%s2338_s3 + $0x138] sm:$0xff]  ;;  %v545_v5 = vld [vmem:[%s1645_s30 + $0x4c0] sm:$0xff] }
  0x58   : > { %906 = vmatpush.msrb.mxu3 %v508_v6  ;;  %872 = vmatpush.msrb.mxu2 %v491_v7  ;;  %v576_v6 = vld [vmem:[%s1645_s30 + $0x5b8] sm:$0xff]  ;;  %v559_v7 = vld [vmem:[%s1645_s30 + $0x530] sm:$0xff] }
  0x59   : > { %836 = vmatpush.msrb.mxu1 %v476_v8  ;;  %802 = vmatpush.msrb.mxu0 %v459_v9  ;;  %v544_v8 = vld [vmem:[%s1645_s30 + $0x4b8] sm:$0xff]  ;;  %v527_v9 = vld [vmem:[%s1645_s30 + $0x430] sm:$0xff] }
  0x5a   : > { %907 = vmatpush.msrb.mxu3 %v507_v10  ;;  %873 = vmatpush.msrb.mxu2 %v490_v11  ;;  %v575_v10 = vld [vmem:[%s1645_s30 + $0x5b0] sm:$0xff]  ;;  %v558_v11 = vld [vmem:[%s1645_s30 + $0x528] sm:$0xff] }
  0x5b   : > { %837 = vmatpush.msrb.mxu1 %v475_v12  ;;  %803 = vmatpush.msrb.mxu0 %v458_v13  ;;  %v543_v12 = vld [vmem:[%s1645_s30 + $0x4b0] sm:$0xff]  ;;  %v526_v13 = vld [vmem:[%s1645_s30 + $0x428] sm:$0xff] }
  0x5c   : > { %680 = vmatmul.f32.gmra.mxu0 %v377_v14  ;;  %750 = vmatmul.f32.gmra.mxu2 %v379_v15  ;;  %v349_v14 = vld [vmem:[%s2338_s3 + $0x1a0] sm:$0xff]  ;;  %v351_v15 = vld [vmem:[%s2338_s3 + $0x1b0] sm:$0xff] }
  0x5d   : > { %908 = vmatpush.msrb.mxu3 %v506_v16  ;;  %874 = vmatpush.msrb.mxu2 %v489_v17  ;;  %v574_v16 = vld [vmem:[%s1645_s30 + $0x5a8] sm:$0xff]  ;;  %v557_v17 = vld [vmem:[%s1645_s30 + $0x520] sm:$0xff] }
  0x5e   : > { %715 = vmatmul.f32.gmra.mxu1 %v378_v18  ;;  %804 = vmatpush.msrb.mxu0 %v457_v19  ;;  %v350_v18 = vld [vmem:[%s2338_s3 + $0x1a8] sm:$0xff]  ;;  %v525_v19 = vld [vmem:[%s1645_s30 + $0x420] sm:$0xff] }
  0x5f   : > { %785 = vmatmul.f32.gmra.mxu3 %v380_v20  ;;  %838 = vmatpush.msrb.mxu1 %v474_v21  ;;  %v352_v20 = vld [vmem:[%s2338_s3 + $0x1b8] sm:$0xff]  ;;  %v542_v21 = vld [vmem:[%s1645_s30 + $0x4a8] sm:$0xff] }
  0x60   : > { %909 = vmatpush.msrb.mxu3 %v505_v22  ;;  %999 = vmatpush.msra.mxu2 %v568_v23  ;;  %v573_v22 = vld [vmem:[%s1645_s30 + $0x5a0] sm:$0xff]  ;;  %v556_v23 = vld [vmem:[%s1645_s30 + $0x518] sm:$0xff] }
  0x61   : > { %839 = vmatpush.msrb.mxu1 %v473_v24  ;;  %929 = vmatpush.msra.mxu0 %v536_v25  ;;  %v541_v24 = vld [vmem:[%s1645_s30 + $0x4a0] sm:$0xff]  ;;  %v524_v25 = vld [vmem:[%s1645_s30 + $0x418] sm:$0xff] }
  0x62   : > { %1034 = vmatpush.msra.mxu3 %v584_v26  ;;  %1000 = vmatpush.msra.mxu2 %v567_v27  ;;  %v572_v26 = vld [vmem:[%s1645_s30 + $0x598] sm:$0xff]  ;;  %v555_v27 = vld [vmem:[%s1645_s30 + $0x510] sm:$0xff] }
  0x63   : > { %964 = vmatpush.msra.mxu1 %v552_v28  ;;  %930 = vmatpush.msra.mxu0 %v535_v29  ;;  %v540_v28 = vld [vmem:[%s1645_s30 + $0x498] sm:$0xff]  ;;  %v523_v29 = vld [vmem:[%s1645_s30 + $0x410] sm:$0xff] }
  0x64   : > { %805 = vmatmul.f32.vlgmr.msrb.gmra.mxu0 %v301_v30  ;;  %875 = vmatmul.f32.vlgmr.msrb.gmra.mxu2 %v303_v31  ;;  %v365_v30 = vld [vmem:[%s2338_s3 + $0x220] sm:$0xff]  ;;  %v367_v31 = vld [vmem:[%s2338_s3 + $0x230] sm:$0xff] }
  0x65   : > { %1035 = vmatpush.msra.mxu3 %v583_v32  ;;  %1001 = vmatpush.msra.mxu2 %v566_v33  ;;  %v571_v32 = vld [vmem:[%s1645_s30 + $0x590] sm:$0xff]  ;;  %v554_v33 = vld [vmem:[%s1645_s30 + $0x508] sm:$0xff] }
  0x66   : > { %840 = vmatmul.f32.vlgmr.msrb.gmra.mxu1 %v302_v34  ;;  %931 = vmatpush.msra.mxu0 %v534_v35  ;;  %v366_v34 = vld [vmem:[%s2338_s3 + $0x228] sm:$0xff] }
  0x67   : > { %910 = vmatmul.f32.vlgmr.msrb.gmra.mxu3 %v304_v36  ;;  %965 = vmatpush.msra.mxu1 %v551_v37  ;;  %v522_v35 = vld [vmem:[%s1645_s30 + $0x408] sm:$0xff]  ;;  %v368_v36 = vld [vmem:[%s2338_s3 + $0x238] sm:$0xff]  ;;  %v539_v37 = vld [vmem:[%s1645_s30 + $0x490] sm:$0xff] }
  0x68   : > { %1036 = vmatpush.msra.mxu3 %v582_v38  ;;  %1002 = vmatpush.msra.mxu2 %v565_v39  ;;  %v570_v38 = vld [vmem:[%s1645_s30 + $0x588] sm:$0xff]  ;;  %v553_v39 = vld [vmem:[%s1645_s30 + $0x500] sm:$0xff] }
  0x69   : > { %966 = vmatpush.msra.mxu1 %v550_v40  ;;  %932 = vmatpush.msra.mxu0 %v533_v41  ;;  %v538_v40 = vld [vmem:[%s1645_s30 + $0x488] sm:$0xff]  ;;  %v521_v41 = vld [vmem:[%s1645_s30 + $0x400] sm:$0xff] }
  0x6a   : > { %1037 = vmatpush.msra.mxu3 %v581_v42  ;;  %1003 = vmatpush.msra.mxu2 %v564_v43  ;;  %v569_v42 = vld [vmem:[%s1645_s30 + $0x580] sm:$0xff]  ;;  %v632_v43 = vld [vmem:[%s1645_s30 + $0x778] sm:$0xff] }
  0x6b   : > { %967 = vmatpush.msra.mxu1 %v549_v44  ;;  %933 = vmatpush.msra.mxu0 %v532_v45  ;;  %v537_v44 = vld [vmem:[%s1645_s30 + $0x480] sm:$0xff]  ;;  %v600_v45 = vld [vmem:[%s1645_s30 + $0x678] sm:$0xff] }
  0x6c   : > { %808 = vmatmul.f32.gmra.mxu0 %v317_v46  ;;  %878 = vmatmul.f32.gmra.mxu2 %v319_v47  ;;  %v381_v46 = vld [vmem:[%s2338_s3 + $0x2a0] sm:$0xff]  ;;  %v383_v47 = vld [vmem:[%s2338_s3 + $0x2b0] sm:$0xff] }
  0x6d   : > { %1038 = vmatpush.msra.mxu3 %v580_v48  ;;  %1004 = vmatpush.msra.mxu2 %v563_v49  ;;  %v648_v48 = vld [vmem:[%s1645_s30 + $0x7f8] sm:$0xff]  ;;  %v631_v49 = vld [vmem:[%s1645_s30 + $0x770] sm:$0xff] }
  0x6e   : > { %843 = vmatmul.f32.gmra.mxu1 %v318_v50  ;;  %934 = vmatpush.msra.mxu0 %v531_v51  ;;  %v382_v50 = vld [vmem:[%s2338_s3 + $0x2a8] sm:$0xff]  ;;  %v599_v51 = vld [vmem:[%s1645_s30 + $0x670] sm:$0xff] }
  0x6f   : > { %913 = vmatmul.f32.gmra.mxu3 %v320_v52  ;;  %968 = vmatpush.msra.mxu1 %v548_v53  ;;  %v384_v52 = vld [vmem:[%s2338_s3 + $0x2b8] sm:$0xff] }
  0x70   : > { %1039 = vmatpush.msra.mxu3 %v579_v54  ;;  %1005 = vmatpush.msra.mxu2 %v562_v55  ;;  %v616_v53 = vld [vmem:[%s1645_s30 + $0x6f8] sm:$0xff]  ;;  %v647_v54 = vld [vmem:[%s1645_s30 + $0x7f0] sm:$0xff]  ;;  %v630_v55 = vld [vmem:[%s1645_s30 + $0x768] sm:$0xff] }
  0x71   : > { %969 = vmatpush.msra.mxu1 %v547_v56  ;;  %935 = vmatpush.msra.mxu0 %v530_v57  ;;  %v615_v56 = vld [vmem:[%s1645_s30 + $0x6f0] sm:$0xff]  ;;  %v598_v57 = vld [vmem:[%s1645_s30 + $0x668] sm:$0xff] }
  0x72   : > { %1040 = vmatpush.msra.mxu3 %v578_v58  ;;  %1006 = vmatpush.msra.mxu2 %v561_v59  ;;  %v646_v58 = vld [vmem:[%s1645_s30 + $0x7e8] sm:$0xff]  ;;  %v629_v59 = vld [vmem:[%s1645_s30 + $0x760] sm:$0xff] }
  0x73   : > { %970 = vmatpush.msra.mxu1 %v546_v60  ;;  %936 = vmatpush.msra.mxu0 %v529_v61  ;;  %v614_v60 = vld [vmem:[%s1645_s30 + $0x6e8] sm:$0xff]  ;;  %v597_v61 = vld [vmem:[%s1645_s30 + $0x660] sm:$0xff] }
  0x74   : > { %811 = vmatmul.f32.gmra.mxu0 %v333_v62  ;;  %881 = vmatmul.f32.gmra.mxu2 %v335_v63  ;;  %v305_v62 = vld [vmem:[%s2338_s3 + $0x40] sm:$0xff]  ;;  %v307_v63 = vld [vmem:[%s2338_s3 + $0x50] sm:$0xff] }
  0x75   : > { %1041 = vmatpush.msra.mxu3 %v577_v0  ;;  %1007 = vmatpush.msra.mxu2 %v560_v1  ;;  %v645_v0 = vld [vmem:[%s1645_s30 + $0x7e0] sm:$0xff]  ;;  %v628_v1 = vld [vmem:[%s1645_s30 + $0x758] sm:$0xff] }
  0x76   : > { %846 = vmatmul.f32.gmra.mxu1 %v334_v2  ;;  %937 = vmatpush.msra.mxu0 %v528_v3  ;;  %v306_v2 = vld [vmem:[%s2338_s3 + $0x48] sm:$0xff]  ;;  %v596_v3 = vld [vmem:[%s1645_s30 + $0x658] sm:$0xff] }
  0x77   : > { %916 = vmatmul.f32.gmra.mxu3 %v336_v4  ;;  %971 = vmatpush.msra.mxu1 %v545_v5  ;;  %v308_v4 = vld [vmem:[%s2338_s3 + $0x58] sm:$0xff]  ;;  %v613_v5 = vld [vmem:[%s1645_s30 + $0x6e0] sm:$0xff] }
  0x78   : > { %1042 = vmatpush.msra.mxu3 %v576_v6  ;;  %1008 = vmatpush.msra.mxu2 %v559_v7  ;;  %v644_v6 = vld [vmem:[%s1645_s30 + $0x7d8] sm:$0xff]  ;;  %v627_v7 = vld [vmem:[%s1645_s30 + $0x750] sm:$0xff] }
  0x79   : > { %972 = vmatpush.msra.mxu1 %v544_v8  ;;  %938 = vmatpush.msra.mxu0 %v527_v9  ;;  %v612_v8 = vld [vmem:[%s1645_s30 + $0x6d8] sm:$0xff]  ;;  %v595_v9 = vld [vmem:[%s1645_s30 + $0x650] sm:$0xff] }
  0x7a   : > { %1043 = vmatpush.msra.mxu3 %v575_v10  ;;  %1009 = vmatpush.msra.mxu2 %v558_v11  ;;  %v643_v10 = vld [vmem:[%s1645_s30 + $0x7d0] sm:$0xff]  ;;  %v626_v11 = vld [vmem:[%s1645_s30 + $0x748] sm:$0xff] }
  0x7b   : > { %973 = vmatpush.msra.mxu1 %v543_v12  ;;  %939 = vmatpush.msra.mxu0 %v526_v13  ;;  %v611_v12 = vld [vmem:[%s1645_s30 + $0x6d0] sm:$0xff]  ;;  %v594_v13 = vld [vmem:[%s1645_s30 + $0x648] sm:$0xff] }
  0x7c   : > { %814 = vmatmul.f32.gmra.mxu0 %v349_v14  ;;  %884 = vmatmul.f32.gmra.mxu2 %v351_v15  ;;  %v321_v14 = vld [vmem:[%s2338_s3 + $0xc0] sm:$0xff]  ;;  %v323_v15 = vld [vmem:[%s2338_s3 + $0xd0] sm:$0xff] }
  0x7d   : > { %1044 = vmatpush.msra.mxu3 %v574_v16  ;;  %1010 = vmatpush.msra.mxu2 %v557_v17  ;;  %v642_v16 = vld [vmem:[%s1645_s30 + $0x7c8] sm:$0xff]  ;;  %v625_v17 = vld [vmem:[%s1645_s30 + $0x740] sm:$0xff] }
  0x7e   : > { %849 = vmatmul.f32.gmra.mxu1 %v350_v18  ;;  %940 = vmatpush.msra.mxu0 %v525_v19  ;;  %v322_v18 = vld [vmem:[%s2338_s3 + $0xc8] sm:$0xff]  ;;  %v593_v19 = vld [vmem:[%s1645_s30 + $0x640] sm:$0xff] }
  0x7f   : > { %919 = vmatmul.f32.gmra.mxu3 %v352_v20  ;;  %974 = vmatpush.msra.mxu1 %v542_v21  ;;  %v324_v20 = vld [vmem:[%s2338_s3 + $0xd8] sm:$0xff]  ;;  %v610_v21 = vld [vmem:[%s1645_s30 + $0x6c8] sm:$0xff] }
  0x80   : > { %1045 = vmatpush.msra.mxu3 %v573_v22  ;;  %1011 = vmatpush.msra.mxu2 %v556_v23  ;;  %v641_v22 = vld [vmem:[%s1645_s30 + $0x7c0] sm:$0xff]  ;;  %v624_v23 = vld [vmem:[%s1645_s30 + $0x738] sm:$0xff] }
  0x81   : > { %975 = vmatpush.msra.mxu1 %v541_v24  ;;  %941 = vmatpush.msra.mxu0 %v524_v25  ;;  %v609_v24 = vld [vmem:[%s1645_s30 + $0x6c0] sm:$0xff]  ;;  %v592_v25 = vld [vmem:[%s1645_s30 + $0x638] sm:$0xff] }
  0x82   : > { %1046 = vmatpush.msra.mxu3 %v572_v26  ;;  %1012 = vmatpush.msra.mxu2 %v555_v27  ;;  %v640_v26 = vld [vmem:[%s1645_s30 + $0x7b8] sm:$0xff]  ;;  %v623_v27 = vld [vmem:[%s1645_s30 + $0x730] sm:$0xff] }
  0x83   : > { %976 = vmatpush.msra.mxu1 %v540_v28  ;;  %942 = vmatpush.msra.mxu0 %v523_v29  ;;  %v608_v28 = vld [vmem:[%s1645_s30 + $0x6b8] sm:$0xff]  ;;  %v591_v29 = vld [vmem:[%s1645_s30 + $0x630] sm:$0xff] }
  0x84   : > { %817 = vmatmul.f32.gmra.mxu0 %v365_v30  ;;  %887 = vmatmul.f32.gmra.mxu2 %v367_v31  ;;  %v337_v30 = vld [vmem:[%s2338_s3 + $0x140] sm:$0xff]  ;;  %v339_v31 = vld [vmem:[%s2338_s3 + $0x150] sm:$0xff] }
  0x85   : > { %1047 = vmatpush.msra.mxu3 %v571_v32  ;;  %1013 = vmatpush.msra.mxu2 %v554_v33  ;;  %v639_v32 = vld [vmem:[%s1645_s30 + $0x7b0] sm:$0xff]  ;;  %v622_v33 = vld [vmem:[%s1645_s30 + $0x728] sm:$0xff] }
  0x86   : > { %852 = vmatmul.f32.gmra.mxu1 %v366_v34  ;;  %943 = vmatpush.msra.mxu0 %v522_v35  ;;  %v338_v34 = vld [vmem:[%s2338_s3 + $0x148] sm:$0xff] }
  0x87   : > { %922 = vmatmul.f32.gmra.mxu3 %v368_v36  ;;  %977 = vmatpush.msra.mxu1 %v539_v37  ;;  %v590_v35 = vld [vmem:[%s1645_s30 + $0x628] sm:$0xff]  ;;  %v340_v36 = vld [vmem:[%s2338_s3 + $0x158] sm:$0xff]  ;;  %v607_v37 = vld [vmem:[%s1645_s30 + $0x6b0] sm:$0xff] }
  0x88   : > { %1048 = vmatpush.msra.mxu3 %v570_v38  ;;  %1014 = vmatpush.msra.mxu2 %v553_v39  ;;  %v638_v38 = vld [vmem:[%s1645_s30 + $0x7a8] sm:$0xff]  ;;  %v621_v39 = vld [vmem:[%s1645_s30 + $0x720] sm:$0xff] }
  0x89   : > { %978 = vmatpush.msra.mxu1 %v538_v40  ;;  %944 = vmatpush.msra.mxu0 %v521_v41  ;;  %v606_v40 = vld [vmem:[%s1645_s30 + $0x6a8] sm:$0xff]  ;;  %v589_v41 = vld [vmem:[%s1645_s30 + $0x620] sm:$0xff] }
  0x8a   : > { %1049 = vmatpush.msra.mxu3 %v569_v42  ;;  %1139 = vmatpush.msrb.mxu2 %v632_v43  ;;  %v637_v42 = vld [vmem:[%s1645_s30 + $0x7a0] sm:$0xff]  ;;  %v620_v43 = vld [vmem:[%s1645_s30 + $0x718] sm:$0xff] }
  0x8b   : > { %979 = vmatpush.msra.mxu1 %v537_v44  ;;  %1069 = vmatpush.msrb.mxu0 %v600_v45  ;;  %v605_v44 = vld [vmem:[%s1645_s30 + $0x6a0] sm:$0xff]  ;;  %v588_v45 = vld [vmem:[%s1645_s30 + $0x618] sm:$0xff] }
  0x8c   : > { %820 = vmatmul.f32.gmra.mxu0 %v381_v46  ;;  %890 = vmatmul.f32.gmra.mxu2 %v383_v47  ;;  %v353_v46 = vld [vmem:[%s2338_s3 + $0x1c0] sm:$0xff]  ;;  %v355_v47 = vld [vmem:[%s2338_s3 + $0x1d0] sm:$0xff] }
  0x8d   : > { %1174 = vmatpush.msrb.mxu3 %v648_v48  ;;  %1140 = vmatpush.msrb.mxu2 %v631_v49  ;;  %v636_v48 = vld [vmem:[%s1645_s30 + $0x798] sm:$0xff]  ;;  %v619_v49 = vld [vmem:[%s1645_s30 + $0x710] sm:$0xff] }
  0x8e   : > { %855 = vmatmul.f32.gmra.mxu1 %v382_v50  ;;  %1070 = vmatpush.msrb.mxu0 %v599_v51  ;;  %v354_v50 = vld [vmem:[%s2338_s3 + $0x1c8] sm:$0xff]  ;;  %v587_v51 = vld [vmem:[%s1645_s30 + $0x610] sm:$0xff] }
  0x8f   : > { %925 = vmatmul.f32.gmra.mxu3 %v384_v52  ;;  %1104 = vmatpush.msrb.mxu1 %v616_v53  ;;  %v356_v52 = vld [vmem:[%s2338_s3 + $0x1d8] sm:$0xff] }
  0x90   : > { %1175 = vmatpush.msrb.mxu3 %v647_v54  ;;  %1141 = vmatpush.msrb.mxu2 %v630_v55  ;;  %v604_v53 = vld [vmem:[%s1645_s30 + $0x698] sm:$0xff]  ;;  %v635_v54 = vld [vmem:[%s1645_s30 + $0x790] sm:$0xff]  ;;  %v618_v55 = vld [vmem:[%s1645_s30 + $0x708] sm:$0xff] }
  0x91   : > { %1105 = vmatpush.msrb.mxu1 %v615_v56  ;;  %1071 = vmatpush.msrb.mxu0 %v598_v57  ;;  %v603_v56 = vld [vmem:[%s1645_s30 + $0x690] sm:$0xff]  ;;  %v586_v57 = vld [vmem:[%s1645_s30 + $0x608] sm:$0xff] }
  0x92   : > { %1176 = vmatpush.msrb.mxu3 %v646_v58  ;;  %1142 = vmatpush.msrb.mxu2 %v629_v59  ;;  %v634_v58 = vld [vmem:[%s1645_s30 + $0x788] sm:$0xff]  ;;  %v617_v59 = vld [vmem:[%s1645_s30 + $0x700] sm:$0xff] }
  0x93   : > { %1106 = vmatpush.msrb.mxu1 %v614_v60  ;;  %1072 = vmatpush.msrb.mxu0 %v597_v61  ;;  %v602_v60 = vld [vmem:[%s1645_s30 + $0x688] sm:$0xff]  ;;  %v585_v61 = vld [vmem:[%s1645_s30 + $0x600] sm:$0xff] }
  0x94   : > { %945 = vmatmul.f32.vlgmr.msra.gmra.mxu0 %v305_v62  ;;  %1015 = vmatmul.f32.vlgmr.msra.gmra.mxu2 %v307_v63  ;;  %v369_v63 = vld [vmem:[%s2338_s3 + $0x240] sm:$0xff] }
  0x95   : > { %1177 = vmatpush.msrb.mxu3 %v645_v0  ;;  %1143 = vmatpush.msrb.mxu2 %v628_v1  ;;  %v371_v0 = vld [vmem:[%s2338_s3 + $0x250] sm:$0xff]  ;;  %v633_v1 = vld [vmem:[%s1645_s30 + $0x780] sm:$0xff] }
  0x96   : > { %980 = vmatmul.f32.vlgmr.msra.gmra.mxu1 %v306_v2  ;;  %1073 = vmatpush.msrb.mxu0 %v596_v3  ;;  %v601_v2 = vld [vmem:[%s1645_s30 + $0x680] sm:$0xff] }
  0x97   : > { %1050 = vmatmul.f32.vlgmr.msra.gmra.mxu3 %v308_v4  ;;  %1107 = vmatpush.msrb.mxu1 %v613_v5  ;;  %v370_v4 = vld [vmem:[%s2338_s3 + $0x248] sm:$0xff] }
  0x98   : > { %1178 = vmatpush.msrb.mxu3 %v644_v6  ;;  %1144 = vmatpush.msrb.mxu2 %v627_v7  ;;  %v372_v6 = vld [vmem:[%s2338_s3 + $0x258] sm:$0xff] }
  0x99   : > { %1108 = vmatpush.msrb.mxu1 %v612_v8  ;;  %1074 = vmatpush.msrb.mxu0 %v595_v9 }
  0x9a   : > { %1179 = vmatpush.msrb.mxu3 %v643_v10  ;;  %1145 = vmatpush.msrb.mxu2 %v626_v11  ;;  %v385_v10 = vld [vmem:[%s2338_s3 + $0x2c0] sm:$0xff]  ;;  %v387_v11 = vld [vmem:[%s2338_s3 + $0x2d0] sm:$0xff] }
  0x9b   : > { %1109 = vmatpush.msrb.mxu1 %v611_v12  ;;  %1075 = vmatpush.msrb.mxu0 %v594_v13  ;;  %v1591_v12 = vmov 0   ;;  %v1216_v13 = vld [vmem:[%s282_s19] sm:$0xff] }
  0x9c   : > { %948 = vmatmul.f32.gmra.mxu0 %v321_v14  ;;  %1018 = vmatmul.f32.gmra.mxu2 %v323_v15 }
  0x9d   : > { %1180 = vmatpush.msrb.mxu3 %v642_v16  ;;  %1146 = vmatpush.msrb.mxu2 %v625_v17  ;;  %v386_v17 = vld [vmem:[%s2338_s3 + $0x2c8] sm:$0xff] }
  0x9e   : > { %983 = vmatmul.f32.gmra.mxu1 %v322_v18  ;;  %1076 = vmatpush.msrb.mxu0 %v593_v19  ;;  %v388_v19 = vld [vmem:[%s2338_s3 + $0x2d8] sm:$0xff] }
  0x9f   : > { %1053 = vmatmul.f32.gmra.mxu3 %v324_v20  ;;  %1110 = vmatpush.msrb.mxu1 %v610_v21 }
  0xa0   : > { %1181 = vmatpush.msrb.mxu3 %v641_v22  ;;  %1147 = vmatpush.msrb.mxu2 %v624_v23  ;;  %v309_v23 = vld [vmem:[%s2338_s3 + $0x60] sm:$0xff] }
  0xa1   : > { %1111 = vmatpush.msrb.mxu1 %v609_v24  ;;  %1077 = vmatpush.msrb.mxu0 %v592_v25  ;;  %v311_v24 = vld [vmem:[%s2338_s3 + $0x70] sm:$0xff]  ;;  %v1217_v25 = vld [vmem:[%s282_s19 + $0x8] sm:$0xff] }
  0xa2   : > { %1182 = vmatpush.msrb.mxu3 %v640_v26  ;;  %1148 = vmatpush.msrb.mxu2 %v623_v27 }
  0xa3   : > { %1112 = vmatpush.msrb.mxu1 %v608_v28  ;;  %1078 = vmatpush.msrb.mxu0 %v591_v29  ;;  %v310_v29 = vld [vmem:[%s2338_s3 + $0x68] sm:$0xff] }
  0xa4   : > { %951 = vmatmul.f32.gmra.mxu0 %v337_v30  ;;  %1021 = vmatmul.f32.gmra.mxu2 %v339_v31  ;;  %v312_v31 = vld [vmem:[%s2338_s3 + $0x78] sm:$0xff] }
  0xa5   : > { %1183 = vmatpush.msrb.mxu3 %v639_v32  ;;  %1149 = vmatpush.msrb.mxu2 %v622_v33 }
  0xa6   : > { %986 = vmatmul.f32.gmra.mxu1 %v338_v34  ;;  %1079 = vmatpush.msrb.mxu0 %v590_v35  ;;  %v325_v35 = vld [vmem:[%s2338_s3 + $0xe0] sm:$0xff] }
  0xa7   : > { %1056 = vmatmul.f32.gmra.mxu3 %v340_v36  ;;  %1113 = vmatpush.msrb.mxu1 %v607_v37  ;;  %v327_v36 = vld [vmem:[%s2338_s3 + $0xf0] sm:$0xff] }
  0xa8   : > { %1184 = vmatpush.msrb.mxu3 %v638_v38  ;;  %1150 = vmatpush.msrb.mxu2 %v621_v39 }
  0xa9   : > { %1114 = vmatpush.msrb.mxu1 %v606_v40  ;;  %1080 = vmatpush.msrb.mxu0 %v589_v41  ;;  %v326_v40 = vld [vmem:[%s2338_s3 + $0xe8] sm:$0xff] }
  0xaa   : > { %1185 = vmatpush.msrb.mxu3 %v637_v42  ;;  %1151 = vmatpush.msrb.mxu2 %v620_v43  ;;  %v328_v42 = vld [vmem:[%s2338_s3 + $0xf8] sm:$0xff] }
  0xab   : > { %1115 = vmatpush.msrb.mxu1 %v605_v44  ;;  %1081 = vmatpush.msrb.mxu0 %v588_v45 }
  0xac   : > { %954 = vmatmul.f32.gmra.mxu0 %v353_v46  ;;  %1024 = vmatmul.f32.gmra.mxu2 %v355_v47  ;;  %v341_v46 = vld [vmem:[%s2338_s3 + $0x160] sm:$0xff]  ;;  %v343_v47 = vld [vmem:[%s2338_s3 + $0x170] sm:$0xff] }
  0xad   : > { %1186 = vmatpush.msrb.mxu3 %v636_v48  ;;  %1152 = vmatpush.msrb.mxu2 %v619_v49 }
  0xae   : > { %989 = vmatmul.f32.gmra.mxu1 %v354_v50  ;;  %1082 = vmatpush.msrb.mxu0 %v587_v51  ;;  %v342_v51 = vld [vmem:[%s2338_s3 + $0x168] sm:$0xff] }
  0xaf   : > { %1059 = vmatmul.f32.gmra.mxu3 %v356_v52  ;;  %1116 = vmatpush.msrb.mxu1 %v604_v53  ;;  %v344_v53 = vld [vmem:[%s2338_s3 + $0x178] sm:$0xff] }
  0xb0   : > { %1187 = vmatpush.msrb.mxu3 %v635_v54  ;;  %1153 = vmatpush.msrb.mxu2 %v618_v55 }
  0xb1   : > { %v666_v62 = vpop.f32.mrf.mxu0  ;;  %1117 = vmatpush.msrb.mxu1 %v603_v56  ;;  %1083 = vmatpush.msrb.mxu0 %v586_v57  ;;  %v357_v57 = vld [vmem:[%s2338_s3 + $0x1e0] sm:$0xff] }
  0xb2   : > { %1188 = vmatpush.msrb.mxu3 %v634_v58  ;;  %1154 = vmatpush.msrb.mxu2 %v617_v59  ;;  %v359_v58 = vld [vmem:[%s2338_s3 + $0x1f0] sm:$0xff] }
  0xb3   : > { %v701_v3 = vpop.f32.mrf.mxu1  ;;  %1118 = vmatpush.msrb.mxu1 %v602_v60  ;;  %1084 = vmatpush.msrb.mxu0 %v585_v61 }
  0xb4   : > { %v702_v5 = vadd.f32 %v701_v3, %v666_v62  ;;  %957 = vmatmul.f32.gmra.mxu0 %v369_v63  ;;  %1027 = vmatmul.f32.gmra.mxu2 %v371_v0  ;;  %v358_v62 = vld [vmem:[%s2338_s3 + $0x1e8] sm:$0xff]  ;;  %v360_v0 = vld [vmem:[%s2338_s3 + $0x1f8] sm:$0xff] }
  0xb5   : > { %1189 = vmatpush.msrb.mxu3 %v633_v1  ;;  %1119 = vmatpush.msrb.mxu1 %v601_v2 }
  0xb6   : > { %992 = vmatmul.f32.gmra.mxu1 %v370_v4  ;;  %1556 = vset.pattern.permute.xlu0 %v1591_v12  ;;  %v373_v4 = vld [vmem:[%s2338_s3 + $0x260] sm:$0xff]  ;;  %v376_v12 = vld [vmem:[%s2338_s3 + $0x278] sm:$0xff] }
  0xb7   : > { %1062 = vmatmul.f32.gmra.mxu3 %v372_v6  ;;  %v736_v7 = vpop.f32.mrf.mxu2  ;;  %1237 = vperm.xlu0 %1556, %v1216_v13  }
  0xb8   : > { %v737_v8 = vadd.f32 %v736_v7, %v702_v5  ;;  %v375_v5 = vld [vmem:[%s2338_s3 + $0x270] sm:$0xff] }
  0xb9   : > { %v669_v9 = vpop.f32.mrf.mxu0 }
  0xba   : > { %v771_v14 = vpop.f32.mrf.mxu3 }
  0xbb   : > { %v2117_v15 = vadd.f32 %v771_v14, %v737_v8  ;;  %v704_v16 = vpop.f32.mrf.mxu1 }
  0xbc   : > { %v705_v18 = vadd.f32 %v704_v16, %v669_v9  ;;  %960 = vmatmul.f32.gmra.mxu0 %v385_v10  ;;  %1030 = vmatmul.f32.gmra.mxu2 %v387_v11  ;;  %v374_v10 = vld [vmem:[%s2338_s3 + $0x268] sm:$0xff] }
  0xbe   : > { %995 = vmatmul.f32.gmra.mxu1 %v386_v17  ;;  %v391_v17 = vld [vmem:[%s2338_s3 + $0x2f0] sm:$0xff] }
  0xbf   : > { %1065 = vmatmul.f32.gmra.mxu3 %v388_v19  ;;  %v739_v20 = vpop.f32.mrf.mxu2  ;;  %1242 = vperm.xlu0 %1556, %v1217_v25  }
  0xc0   : > { %v740_v21 = vadd.f32 %v739_v20, %v705_v18 }
  0xc1   : > { %v672_v22 = vpop.f32.mrf.mxu0 }
  0xc2   : > { %v774_v26 = vpop.f32.mrf.mxu3 }
  0xc3   : > { %v2131_v27 = vadd.f32 %v774_v26, %v740_v21  ;;  %v707_v28 = vpop.f32.mrf.mxu1 }
  0xc4   : > { %v708_v30 = vadd.f32 %v707_v28, %v672_v22  ;;  %1085 = vmatmul.f32.vlgmr.msrb.gmra.mxu0 %v309_v23  ;;  %1155 = vmatmul.f32.vlgmr.msrb.gmra.mxu2 %v311_v24  ;;  %v390_v22 = vld [vmem:[%s2338_s3 + $0x2e8] sm:$0xff]  ;;  %v392_v24 = vld [vmem:[%s2338_s3 + $0x2f8] sm:$0xff] }
  0xc6   : > { %1120 = vmatmul.f32.vlgmr.msrb.gmra.mxu1 %v310_v29 }
  0xc7   : > { %1190 = vmatmul.f32.vlgmr.msrb.gmra.mxu3 %v312_v31  ;;  %v742_v32 = vpop.f32.mrf.mxu2 }
  0xc8   : > { %v743_v33 = vadd.f32 %v742_v32, %v708_v30 }
  0xc9   : > { %v675_v34 = vpop.f32.mrf.mxu0 }
  0xca   : > { %v777_v37 = vpop.f32.mrf.mxu3 }
  0xcb   : > { %v2145_v38 = vadd.f32 %v777_v37, %v743_v33  ;;  %v710_v39 = vpop.f32.mrf.mxu1 }
  0xcc   : > { %v711_v41 = vadd.f32 %v710_v39, %v675_v34  ;;  %1088 = vmatmul.f32.gmra.mxu0 %v325_v35  ;;  %1158 = vmatmul.f32.gmra.mxu2 %v327_v36 }
  0xce   : > { %1123 = vmatmul.f32.gmra.mxu1 %v326_v40 }
  0xcf   : > { %1193 = vmatmul.f32.gmra.mxu3 %v328_v42  ;;  %v745_v43 = vpop.f32.mrf.mxu2 }
  0xd0   : > { %v746_v44 = vadd.f32 %v745_v43, %v711_v41 }
  0xd1   : > { %v678_v45 = vpop.f32.mrf.mxu0 }
  0xd2   : > { %v780_v48 = vpop.f32.mrf.mxu3 }
  0xd3   : > { %v2159_v49 = vadd.f32 %v780_v48, %v746_v44  ;;  %v713_v50 = vpop.f32.mrf.mxu1 }
  0xd4   : > { %v714_v52 = vadd.f32 %v713_v50, %v678_v45  ;;  %1091 = vmatmul.f32.gmra.mxu0 %v341_v46  ;;  %1161 = vmatmul.f32.gmra.mxu2 %v343_v47 }
  0xd6   : > { %1126 = vmatmul.f32.gmra.mxu1 %v342_v51 }
  0xd7   : > { %1196 = vmatmul.f32.gmra.mxu3 %v344_v53  ;;  %v748_v54 = vpop.f32.mrf.mxu2 }
  0xd8   : > { %v749_v55 = vadd.f32 %v748_v54, %v714_v52 }
  0xd9   : > { %v681_v56 = vpop.f32.mrf.mxu0 }
  0xda   : > { %v783_v59 = vpop.f32.mrf.mxu3 }
  0xdb   : > { %v784_v60 = vadd.f32 %v783_v59, %v749_v55  ;;  %v716_v61 = vpop.f32.mrf.mxu1 }
  0xdc   : > { %v717_v63 = vadd.f32 %v716_v61, %v681_v56  ;;  %1094 = vmatmul.f32.gmra.mxu0 %v357_v57  ;;  %1164 = vmatmul.f32.gmra.mxu2 %v359_v58 }
  0xde   : > { %1129 = vmatmul.f32.gmra.mxu1 %v358_v62 }
  0xdf   : > { %1199 = vmatmul.f32.gmra.mxu3 %v360_v0  ;;  %v751_v1 = vpop.f32.mrf.mxu2 }
  0xe0   : > { %v752_v2 = vadd.f32 %v751_v1, %v717_v63 }
  0xe1   : > { %v806_v3 = vpop.f32.mrf.mxu0 }
  0xe2   : > { %v786_v6 = vpop.f32.mrf.mxu3  ;;  %v807_v7 = vadd.f32 %v806_v3, %v2117_v15  ;;  %v389_v15 = vld [vmem:[%s2338_s3 + $0x2e0] sm:$0xff] }
  0xe3   : > { %v787_v8 = vadd.f32 %v786_v6, %v752_v2  ;;  %v841_v9 = vpop.f32.mrf.mxu1 }
  0xe4   : > { %v842_v11 = vadd.f32 %v841_v9, %v807_v7  ;;  %1097 = vmatmul.f32.gmra.mxu0 %v373_v4  ;;  %1167 = vmatmul.f32.gmra.mxu2 %v375_v5 }
  0xe6   : > { %1132 = vmatmul.f32.gmra.mxu1 %v374_v10 }
  0xe7   : > { %1202 = vmatmul.f32.gmra.mxu3 %v376_v12  ;;  %v876_v13 = vpop.f32.mrf.mxu2 }
  0xe8   : > { %v877_v14 = vadd.f32 %v876_v13, %v842_v11 }
  0xe9   : > { %v809_v16 = vpop.f32.mrf.mxu0 }
  0xea   : > { %v810_v18 = vadd.f32 %v809_v16, %v2131_v27  ;;  %v911_v19 = vpop.f32.mrf.mxu3 }
  0xeb   : > { %v2199_v20 = vadd.f32 %v911_v19, %v877_v14  ;;  %v844_v21 = vpop.f32.mrf.mxu1 }
  0xec   : > { %v845_v23 = vadd.f32 %v844_v21, %v810_v18  ;;  %1100 = vmatmul.f32.gmra.mxu0 %v389_v15  ;;  %1170 = vmatmul.f32.gmra.mxu2 %v391_v17 }
  0xee   : > { %1135 = vmatmul.f32.gmra.mxu1 %v390_v22 }
  0xef   : > { %1205 = vmatmul.f32.gmra.mxu3 %v392_v24  ;;  %v879_v25 = vpop.f32.mrf.mxu2 }
  0xf0   : > { %v880_v26 = vadd.f32 %v879_v25, %v845_v23 }
  0xf1   : > { %v812_v27 = vpop.f32.mrf.mxu0 }
  0xf2   : > { %v813_v28 = vadd.f32 %v812_v27, %v2145_v38  ;;  %v914_v29 = vpop.f32.mrf.mxu3 }
  0xf3   : > { %v915_v30 = vadd.f32 %v914_v29, %v880_v26  ;;  %v847_v31 = vpop.f32.mrf.mxu1 }
  0xf4   : > { %v848_v32 = vadd.f32 %v847_v31, %v813_v28 }
  0xf7   : > { %v882_v33 = vpop.f32.mrf.mxu2 }
  0xf8   : > { %v883_v34 = vadd.f32 %v882_v33, %v848_v32 }
  0xf9   : > { %v815_v35 = vpop.f32.mrf.mxu0 }
  0xfa   : > { %v816_v36 = vadd.f32 %v815_v35, %v2159_v49  ;;  %v917_v37 = vpop.f32.mrf.mxu3 }
  0xfb   : > { %v918_v39 = vadd.f32 %v917_v37, %v883_v34  ;;  %v850_v40 = vpop.f32.mrf.mxu1 }
  0xfc   : > { %v851_v41 = vadd.f32 %v850_v40, %v816_v36 }
  0xff   : > { %v885_v42 = vpop.f32.mrf.mxu2 }
 0x100   : > { %v886_v43 = vadd.f32 %v885_v42, %v851_v41 }
 0x101   : > { %v818_v44 = vpop.f32.mrf.mxu0 }
 0x102   : > { %v819_v45 = vadd.f32 %v818_v44, %v784_v60  ;;  %v920_v46 = vpop.f32.mrf.mxu3 }
 0x103   : > { %v2209_v47 = vadd.f32 %v920_v46, %v886_v43  ;;  %v853_v38 = vpop.f32.mrf.mxu1 }
 0x104   : > { %v854_v48 = vadd.f32 %v853_v38, %v819_v45 }
 0x107   : > { %v888_v50 = vpop.f32.mrf.mxu2 }
 0x108   : > { %v889_v51 = vadd.f32 %v888_v50, %v854_v48 }
 0x109   : > { %v821_v52 = vpop.f32.mrf.mxu0 }
 0x10a   : > { %v822_v53 = vadd.f32 %v821_v52, %v787_v8  ;;  %v923_v54 = vpop.f32.mrf.mxu3 }
 0x10b   : > { %v2211_v55 = vadd.f32 %v923_v54, %v889_v51  ;;  %v856_v49 = vpop.f32.mrf.mxu1 }
 0x10c   : > { %v857_v56 = vadd.f32 %v856_v49, %v822_v53 }
 0x10f   : > { %v891_v57 = vpop.f32.mrf.mxu2 }
 0x110   : > { %v892_v58 = vadd.f32 %v891_v57, %v857_v56 }
 0x111   : > { %v946_v59 = vpop.f32.mrf.mxu0 }
 0x112   : > { %v926_v61 = vpop.f32.mrf.mxu3  ;;  %v947_v16 = vadd.f32 %v946_v59, %v2199_v20 }
 0x113   : > { %v2213_v62 = vadd.f32 %v926_v61, %v892_v58  ;;  %v981_v60 = vpop.f32.mrf.mxu1 }
 0x114   : > { %v982_v18 = vadd.f32 %v981_v60, %v947_v16 }
 0x117   : > { %v1016_v63 = vpop.f32.mrf.mxu2 }
 0x118   : > { %v1017_v22 = vadd.f32 %v1016_v63, %v982_v18 }
 0x119   : > { %v949_v0 = vpop.f32.mrf.mxu0 }
 0x11a   : > { %v1051_v1 = vpop.f32.mrf.mxu3  ;;  %v950_v23 = vadd.f32 %v949_v0, %v915_v30 }
 0x11b   : > { %v984_v2 = vpop.f32.mrf.mxu1  ;;  %v1052_v25 = vadd.f32 %v1051_v1, %v1017_v22 }
 0x11c   : > { %v985_v27 = vadd.f32 %v984_v2, %v950_v23 }
 0x11f   : > { %v1019_v3 = vpop.f32.mrf.mxu2 }
 0x120   : > { %v1020_v32 = vadd.f32 %v1019_v3, %v985_v27 }
 0x121   : > { %v952_v4 = vpop.f32.mrf.mxu0 }
 0x122   : > { %v1054_v5 = vpop.f32.mrf.mxu3  ;;  %v953_v20 = vadd.f32 %v952_v4, %v918_v39 }
 0x123   : > { %v987_v6 = vpop.f32.mrf.mxu1  ;;  %v1055_v35 = vadd.f32 %v1054_v5, %v1020_v32 }
 0x124   : > { %v988_v40 = vadd.f32 %v987_v6, %v953_v20 }
 0x127   : > { %v1022_v7 = vpop.f32.mrf.mxu2 }
 0x128   : > { %v1023_v44 = vadd.f32 %v1022_v7, %v988_v40 }
 0x129   : > { %v955_v8 = vpop.f32.mrf.mxu0  ;;  %v2226_v52 = vpop.permute.xlu0 %1237 }
 0x12a   : > { %v1057_v9 = vpop.f32.mrf.mxu3  ;;  %v956_v45 = vadd.f32 %v955_v8, %v2209_v47 }
 0x12b   : > { %v990_v10 = vpop.f32.mrf.mxu1  ;;  %v1058_v48 = vadd.f32 %v1057_v9, %v1023_v44 }
 0x12c   : > { %v991_v51 = vadd.f32 %v990_v10, %v956_v45 }
 0x12f   : > { %v1025_v11 = vpop.f32.mrf.mxu2 }
 0x130   : > { %v1026_v57 = vadd.f32 %v1025_v11, %v991_v51 }
 0x131   : > { %v958_v12 = vpop.f32.mrf.mxu0  ;;  %v2236_v9 = vpop.permute.xlu0 %1242 }
 0x132   : > { %v1060_v13 = vpop.f32.mrf.mxu3  ;;  %v959_v58 = vadd.f32 %v958_v12, %v2211_v55 }
 0x133   : > { %v993_v14 = vpop.f32.mrf.mxu1  ;;  %v1061_v47 = vadd.f32 %v1060_v13, %v1026_v57 }
 0x134   : > { %v994_v1 = vadd.f32 %v993_v14, %v959_v58 }
 0x137   : > { %v1028_v15 = vpop.f32.mrf.mxu2 }
 0x138   : > { %v1029_v7 = vadd.f32 %v1028_v15, %v994_v1 }
 0x139   : > { %v961_v17 = vpop.f32.mrf.mxu0 }
 0x13a   : > { %v2216_v19 = vpop.f32.mrf.mxu3  ;;  %v962_v10 = vadd.f32 %v961_v17, %v2213_v62 }
 0x13b   : > { %v2218_v21 = vpop.f32.mrf.mxu1  ;;  %v1064_v16 = vadd.f32 %v2216_v19, %v1029_v7 }
 0x13c   : > { %v997_v23 = vadd.f32 %v2218_v21, %v962_v10 }
 0x13f   : > { %v2220_v24 = vpop.f32.mrf.mxu2 }
 0x140   : > { %v1032_v62 = vadd.f32 %v2220_v24, %v997_v23 }
 0x141   : > { %v1086_v26 = vpop.f32.mrf.mxu0 }
 0x142   : > { %v2222_v28 = vpop.f32.mrf.mxu3  ;;  %v1087_v29 = vadd.f32 %v1086_v26, %v1052_v25 }
 0x143   : > { %v1121_v31 = vpop.f32.mrf.mxu1  ;;  %v1067_v19 = vadd.f32 %v2222_v28, %v1032_v62 }
 0x144   : > { %v1122_v33 = vadd.f32 %v1121_v31, %v1087_v29 }
 0x147   : > { %v1156_v34 = vpop.f32.mrf.mxu2 }
 0x148   : > { %v1157_v36 = vadd.f32 %v1156_v34, %v1122_v33 }
 0x149   : > { %v1089_v37 = vpop.f32.mrf.mxu0 }
 0x14a   : > { %v1090_v41 = vadd.f32 %v1089_v37, %v1055_v35  ;;  %v1191_v42 = vpop.f32.mrf.mxu3 }
 0x14b   : > { %v1192_v30 = vadd.f32 %v1191_v42, %v1157_v36  ;;  %v1124_v43 = vpop.f32.mrf.mxu1 }
 0x14c   : > { %v1125_v46 = vadd.f32 %v1124_v43, %v1090_v41 }
 0x14d   : > { %1210 = vst.msk [vmem:[#allocation2] sm:$0xff] %vm1209_vm0, %v1192_v30 }
 0x14f   : > { %v1159_v38 = vpop.f32.mrf.mxu2 }
 0x150   : > { %v1160_v39 = vadd.f32 %v1159_v38, %v1125_v46 }
 0x151   : > { %v1092_v50 = vpop.f32.mrf.mxu0 }
 0x152   : > { %v1093_v53 = vadd.f32 %v1092_v50, %v1058_v48  ;;  %v1194_v54 = vpop.f32.mrf.mxu3 }
 0x153   : > { %v1195_v49 = vadd.f32 %v1194_v54, %v1160_v39  ;;  %v1127_v56 = vpop.f32.mrf.mxu1 }
 0x154   : > { %v1128_v59 = vadd.f32 %v1127_v56, %v1093_v53  ;;  %v2230_v60 = vld [vmem:[#allocation2] sm:$0xff] }
 0x155   : > { %1211 = vst.msk [vmem:[#allocation2 + $0x8] sm:$0xff] %vm1209_vm0, %v1195_v49  ;;  %v1245_v4 = vmul.f32 %v2226_v52, %v2230_v60 }
 0x157   : > { %v1162_v61 = vpop.f32.mrf.mxu2  ;;  %v1247_v12 = vsel %vm1209_vm0, %v1245_v4, 0.0 }
 0x158   : > { %v1163_v63 = vadd.f32 %v1162_v61, %v1128_v59 }
 0x159   : > { %v1095_v0 = vpop.f32.mrf.mxu0 }
 0x15a   : > { %v1096_v2 = vadd.f32 %v1095_v0, %v1061_v47  ;;  %v1197_v3 = vpop.f32.mrf.mxu3  ;;  %v1284_v0 = vstv %s1283_s11 }
 0x15b   : > { %v1198_v5 = vadd.f32 %v1197_v3, %v1163_v63  ;;  %v1130_v6 = vpop.f32.mrf.mxu1  ;;  %v1592_v3 = vmov 0.0  }
 0x15c   : > { %v2234_v8 = vld [vmem:[#allocation2 + $0x8] sm:$0xff]  ;;  %v1131_v11 = vadd.f32 %v1130_v6, %v1096_v2 }
 0x15d   : > { %v1246_v55 = vmul.f32 %v2236_v9, %v2234_v8  ;;  %1212 = vst.msk [vmem:[#allocation2 + $0x10] sm:$0xff] %vm1209_vm0, %v1198_v5 }
 0x15f   : > { %v1248_v13 = vsel %vm1209_vm0, %v1246_v55, 0.0  ;;  %v1165_v14 = vpop.f32.mrf.mxu2 }
 0x160   : > { %v1249_v15 = vadd.f32 %v1248_v13, %v1247_v12  ;;  %v1166_v18 = vadd.f32 %v1165_v14, %v1131_v11 }
 0x161   : > { %v1098_v22 = vpop.f32.mrf.mxu0 }
 0x162   : > { %v1250_v25 = vrot.slane %v1249_v15, 4  ;;  %v1099_v26 = vadd.f32 %v1098_v22, %v1064_v16  ;;  %v1200_v27 = vpop.f32.mrf.mxu3 }
 0x163   : > { %v1201_v29 = vadd.f32 %v1200_v27, %v1166_v18  ;;  %v1133_v31 = vpop.f32.mrf.mxu1 }
 0x164   : > { %v1251_v17 = vadd.f32 %v1250_v25, %v1249_v15  ;;  %v1134_v32 = vadd.f32 %v1133_v31, %v1099_v26  ;;  %v1288_v5 = vld [vmem:[#allocation2 + $0x10] sm:$0xff] }
 0x165   : > { %1213 = vst.msk [vmem:[#allocation2 + $0x18] sm:$0xff] %vm1209_vm0, %v1201_v29  ;;  %v1220_v29 = vsel %vm1209_vm0, %v2230_v60, 0.0 }
 0x166   : > { %v1252_v20 = vrot.slane %v1251_v17, 2 }
 0x167   : > { %v1168_v33 = vpop.f32.mrf.mxu2 }
 0x168   : > { %v1169_v34 = vadd.f32 %v1168_v33, %v1134_v32  ;;  %v1253_v35 = vadd.f32 %v1252_v20, %v1251_v17  ;;  %v1228_v33 = vld [vmem:[%s2339_s4] sm:$0xff] }
 0x169   : > { %v1101_v36 = vpop.f32.mrf.mxu0 }
 0x16a   : > { %v1102_v37 = vadd.f32 %v1101_v36, %v1067_v19  ;;  %v1203_v21 = vpop.f32.mrf.mxu3  ;;  %v1254_v40 = vrot.slane %v1253_v35, 1 }
 0x16b   : > { %v1204_v41 = vadd.f32 %v1203_v21, %v1169_v34  ;;  %v1136_v42 = vpop.f32.mrf.mxu1 }
 0x16c   : > { %v1255_v30 = vadd.f32 %v1254_v40, %v1253_v35  ;;  %v1137_v24 = vadd.f32 %v1136_v42, %v1102_v37  ;;  %v1289_v6 = vld [vmem:[#allocation2 + $0x18] sm:$0xff]  ;;  %v1300_v42 = vld [vmem:[%s2339_s4 + $0x10] sm:$0xff] }
 0x16d   : > { %1214 = vst.msk [vmem:[#allocation2 + $0x20] sm:$0xff] %vm1209_vm0, %v1204_v41 }
 0x16e   : > { %v1256_v43 = vsel %vm1209_vm0, %v1255_v30, inf  ;;  %v1259_v28 = vsel %vm1209_vm0, %v1255_v30, -inf }
 0x16f   : > { %1257 = vmin.xlane.f32.xlu1 %v1256_v43  ;;  %v1171_v44 = vpop.f32.mrf.mxu2 }
 0x170   : > { %v1172_v45 = vadd.f32 %v1171_v44, %v1137_v24 }
 0x172   : > { %v1206_v46 = vpop.f32.mrf.mxu3 }
 0x173   : > { %v1207_v38 = vadd.f32 %v1206_v46, %v1172_v45 }
 0x175   : > { %1215 = vst.msk [vmem:[#allocation2 + $0x28] sm:$0xff] %vm1209_vm0, %v1207_v38 }
 0x177   : > { %1260 = vmax.xlane.f32.xlu1 %v1259_v28 }
 0x1e2   : > { %v1258_v48 = vpop.xlane.xlu1 %1257 }
 0x1e3   : > { %v1263_v47 = vsub.f32 %v1255_v30, %v1258_v48 }
 0x1ea   : > { %v1261_v39 = vpop.xlane.xlu1 %1260 }
 0x1eb   : > { %v1262_v50 = vsub.f32 %v1261_v39, %v1258_v48  ;;  %v1344_v48 = vstv %s1528_s23 }
 0x1ed   : > { %vm1264_vm1 = vcmp.ne.f32.partialorder %v1262_v50, 0.0 }
 0x1ee   : > { %v1265_v51 = vsel %vm1264_vm1, %v1262_v50, 1.0 }
 0x1ef   : > { %1557 = vrcp.f32 %v1265_v51  ;;  %v1277_v56 = vand.u32 2147483648, %v1265_v51  ;;  %v1275_v58 = vand.u32 2147483647, %v1265_v51  ;;  %vm1271_vm3 = vweird.f32 %v1265_v51 }
 0x1f1   : > { %v1278_v61 = vor.u32 1.1754944e-38, %v1277_v56  ;;  %vm1276_vm5 = vcmp.eq.f32.partialorder %v1275_v58, 8.507059e+37 }
 0x1f5   : > { %v1558_v53 = vpop.eup %1557 }
 0x1f6   : > { %v1267_v54 = vmul.f32 %v1558_v53, %v1265_v51  ;;  %vm1272_vm2 = vweird.f32 %v1558_v53 }
 0x1f7   : > { %vm1273_vm4 = vmor %vm1271_vm3, %vm1272_vm2 }
 0x1f8   : > { %v1268_v49 = vsub.f32 1.0, %v1267_v54  ;;  %v1350_v54 = vld [vmem:[#allocation2 + $0x28] sm:$0xff] }
 0x1fa   : > { %v1269_v57 = vmul.f32 %v1558_v53, %v1268_v49 }
 0x1fc   : > { %v1270_v59 = vadd.f32 %v1558_v53, %v1269_v57 }
 0x1fe   : > { %v1274_v63 = vsel %vm1273_vm4, %v1558_v53, %v1270_v59  ;;  %v1349_v53 = vld [vmem:[#allocation2 + $0x20] sm:$0xff] }
 0x1ff   : > { %v1279_v1 = vsel %vm1276_vm5, %v1278_v61, %v1274_v63 }
 0x200   : > { %v1280_v2 = vmul.f32 %v1279_v1, %v1263_v47 }
 0x202   : > { %vm1285_vm7 = vcmp.le.f32.partialorder %v1280_v2, %v1284_v0  ;;  %1282 = vst.msk [vmem:[%s2257_s15] sm:$0x1] %vm1281_vm6, %v1280_v2 }
 0x203   : > { %v2262_v4 = vsel %vm1285_vm7, 1.0, %v1592_v3 }
 0x204   : > { %v1290_v7 = vmul.f32 %v2262_v4, %v1288_v5  ;;  %v2266_v55 = vmul.f32 %v2262_v4, %v1289_v6 }
 0x206   : > { %v1306_v10 = vmul.f32 %v1290_v7, %v2226_v52  ;;  %v1307_v11 = vmul.f32 %v2266_v55, %v2236_v9  ;;  %v1292_v31 = vsel %vm1209_vm0, %v1290_v7, 0.0 }
 0x208   : > { %v1308_v12 = vsel %vm1209_vm0, %v1306_v10, 0.0  ;;  %v1309_v13 = vsel %vm1209_vm0, %v1307_v11, 0.0  ;;  %v1361_v11 = vld [vmem:[%s2339_s4 + $0x20] sm:$0xff] }
 0x209   : > { %v1310_v14 = vadd.f32 %v1309_v13, %v1308_v12 }
 0x20b   : > { %v1311_v16 = vrot.slane %v1310_v14, 4 }
 0x20d   : > { %v1312_v15 = vadd.f32 %v1311_v16, %v1310_v14 }
 0x20f   : > { %v1313_v18 = vrot.slane %v1312_v15, 2 }
 0x211   : > { %v1314_v22 = vadd.f32 %v1313_v18, %v1312_v15 }
 0x213   : > { %v1315_v23 = vrot.slane %v1314_v22, 1 }
 0x215   : > { %v1316_v25 = vadd.f32 %v1315_v23, %v1314_v22 }
 0x217   : > { %v1317_v26 = vsel %vm1209_vm0, %v1316_v25, inf  ;;  %v1320_v27 = vsel %vm1209_vm0, %v1316_v25, -inf }
 0x218   : > { %1318 = vmin.xlane.f32.xlu2 %v1317_v26 }
 0x220   : > { %1321 = vmax.xlane.f32.xlu2 %v1320_v27 }
 0x228   : > { %1221 = vadd.xlane.f32.xlu2 %v1220_v29 }
 0x230   : > { %1293 = vadd.xlane.f32.xlu2 %v1292_v31 }
 0x28b   : > { %v1319_v62 = vpop.xlane.xlu2 %1318 }
 0x28c   : > { %v1324_v46 = vsub.f32 %v1316_v25, %v1319_v62 }
 0x293   : > { %v1322_v17 = vpop.xlane.xlu2 %1321 }
 0x294   : > { %v1323_v32 = vsub.f32 %v1322_v17, %v1319_v62 }
 0x296   : > { %vm1325_vm8 = vcmp.ne.f32.partialorder %v1323_v32, 0.0 }
 0x297   : > { %v1326_v20 = vsel %vm1325_vm8, %v1323_v32, 1.0  ;;  %v1301_v32 = vld [vmem:[%s2339_s4 + $0x18] sm:$0xff] }
 0x298   : > { %1559 = vrcp.f32 %v1326_v20  ;;  %v1338_v21 = vand.u32 2147483648, %v1326_v20  ;;  %v1336_v41 = vand.u32 2147483647, %v1326_v20  ;;  %vm1332_vm11 = vweird.f32 %v1326_v20 }
 0x29a   : > { %v1339_v44 = vor.u32 1.1754944e-38, %v1338_v21  ;;  %vm1337_vm13 = vcmp.eq.f32.partialorder %v1336_v41, 8.507059e+37 }
 0x29b   : > { %v1222_v19 = vpop.xlane.xlu2 %1221 }
 0x29c   : > { %v1226_v34 = vmul.f32 0.020408163, %v1222_v19 }
 0x29e   : > { %v1560_v60 = vpop.eup %1559  ;;  %v1230_v35 = vadd.f32 %v1228_v33, %v1226_v34 }
 0x29f   : > { %v1328_v36 = vmul.f32 %v1560_v60, %v1326_v20  ;;  %vm1333_vm10 = vweird.f32 %v1560_v60 }
 0x2a0   : > { %1233 = vst.msk [vmem:[%s2285_s20] sm:$0xff] %vm1232_vm9, %v1230_v35  ;;  %vm1334_vm12 = vmor %vm1332_vm11, %vm1333_vm10 }
 0x2a1   : > { %v1329_v37 = vsub.f32 1.0, %v1328_v36 }
 0x2a3   : > { %v1330_v40 = vmul.f32 %v1560_v60, %v1329_v37  ;;  %v1294_v30 = vpop.xlane.xlu2 %1293 }
 0x2a4   : > { %v1298_v24 = vmul.f32 0.020408163, %v1294_v30 }
 0x2a5   : > { %v1331_v43 = vadd.f32 %v1560_v60, %v1330_v40  ;;  %v1362_v40 = vld [vmem:[%s2339_s4 + $0x28] sm:$0xff] }
 0x2a6   : > { %v1302_v45 = vadd.f32 %v1300_v42, %v1298_v24 }
 0x2a7   : > { %v1335_v38 = vsel %vm1334_vm12, %v1560_v60, %v1331_v43 }
 0x2a8   : > { %1304 = vst.msk [vmem:[%s2285_s20 + $0x10] sm:$0xff] %vm1232_vm9, %v1302_v45  ;;  %v1340_v28 = vsel %vm1337_vm13, %v1339_v44, %v1335_v38 }
 0x2a9   : > { %v1341_v39 = vmul.f32 %v1340_v28, %v1324_v46 }
 0x2ab   : > { %vm1345_vm14 = vcmp.le.f32.partialorder %v1341_v39, %v1344_v48  ;;  %1342 = vst.msk [vmem:[%s2257_s15 + $0x1] sm:$0x1] %vm1281_vm6, %v1341_v39 }
 0x2ac   : > { %v1529_v50 = vsel %vm1345_vm14, 1.0, %v1592_v3 }
 0x2ad   : > { %v1348_v51 = vmul.f32 %v1529_v50, %v2262_v4 }
 0x2af   : > { %v1351_v49 = vmul.f32 %v1349_v53, %v1348_v51  ;;  %v1352_v56 = vmul.f32 %v1350_v54, %v1348_v51 }
 0x2b1   : > { %v1353_v57 = vsel %vm1209_vm0, %v1351_v49, 0.0  ;;  %v1367_v58 = vmul.f32 %v1351_v49, %v2226_v52  ;;  %v1368_v59 = vmul.f32 %v1352_v56, %v2236_v9  ;;  %v1223_v52 = vsel %vm1209_vm0, %v2234_v8, 0.0 }
 0x2b2   : > { %1354 = vadd.xlane.f32.xlu2 %v1353_v57  ;;  %v1295_v9 = vsel %vm1209_vm0, %v2266_v55, 0.0  ;;  %v1356_v10 = vsel %vm1209_vm0, %v1352_v56, 0.0  ;;  %v1229_v55 = vld [vmem:[%s2339_s4 + $0x8] sm:$0xff] }
 0x2b3   : > { %v1369_v61 = vsel %vm1209_vm0, %v1367_v58, 0.0  ;;  %v1370_v47 = vsel %vm1209_vm0, %v1368_v59, 0.0 }
 0x2b4   : > { %v1371_v63 = vadd.f32 %v1370_v47, %v1369_v61 }
 0x2b6   : > { %v1372_v0 = vrot.slane %v1371_v63, 4 }
 0x2b8   : > { %v1373_v1 = vadd.f32 %v1372_v0, %v1371_v63 }
 0x2ba   : > { %v1374_v2 = vrot.slane %v1373_v1, 2 }
 0x2bc   : > { %v1375_v3 = vadd.f32 %v1374_v2, %v1373_v1 }
 0x2be   : > { %v1376_v4 = vrot.slane %v1375_v3, 1 }
 0x2c0   : > { %v1377_v5 = vadd.f32 %v1376_v4, %v1375_v3 }
 0x2c2   : > { %v1381_v6 = vsel %vm1209_vm0, %v1377_v5, -inf  ;;  %v1378_v7 = vsel %vm1209_vm0, %v1377_v5, inf }
 0x2c3   : > { %1382 = vmax.xlane.f32.xlu1 %v1381_v6  ;;  %1379 = vmin.xlane.f32.xlu0 %v1378_v7 }
 0x2cb   : > { %1224 = vadd.xlane.f32.xlu1 %v1223_v52 }
 0x2d3   : > { %1296 = vadd.xlane.f32.xlu1 %v1295_v9 }
 0x2db   : > { %1357 = vadd.xlane.f32.xlu1 %v1356_v10 }
 0x325   : > { %v1355_v12 = vpop.xlane.xlu2 %1354 }
 0x326   : > { %v1359_v13 = vmul.f32 0.020408163, %v1355_v12 }
 0x328   : > { %v1363_v14 = vadd.f32 %v1361_v11, %v1359_v13 }
 0x32a   : > { %1365 = vst.msk [vmem:[%s2285_s20 + $0x20] sm:$0xff] %vm1232_vm9, %v1363_v14 }
 0x336   : > { %v1383_v16 = vpop.xlane.xlu1 %1382  ;;  %v1380_v8 = vpop.xlane.xlu0 %1379 }
 0x337   : > { %v1384_v15 = vsub.f32 %v1383_v16, %v1380_v8  ;;  %v1385_v35 = vsub.f32 %v1377_v5, %v1380_v8 }
 0x339   : > { %vm1386_vm15 = vcmp.ne.f32.partialorder %v1384_v15, 0.0 }
 0x33a   : > { %v1387_v18 = vsel %vm1386_vm15, %v1384_v15, 1.0 }
 0x33b   : > { %1561 = vrcp.f32 %v1387_v18  ;;  %v1399_v31 = vand.u32 2147483648, %v1387_v18  ;;  %v1397_v17 = vand.u32 2147483647, %v1387_v18  ;;  %vm1393_vm1 = vweird.f32 %v1387_v18 }
 0x33d   : > { %v1400_v34 = vor.u32 1.1754944e-38, %v1399_v31  ;;  %vm1398_vm3 = vcmp.eq.f32.partialorder %v1397_v17, 8.507059e+37 }
 0x33e   : > { %v1225_v22 = vpop.xlane.xlu1 %1224 }
 0x33f   : > { %v1227_v23 = vmul.f32 0.020408163, %v1225_v22 }
 0x341   : > { %v1562_v25 = vpop.eup %1561  ;;  %v1231_v26 = vadd.f32 %v1229_v55, %v1227_v23 }
 0x342   : > { %v1389_v27 = vmul.f32 %v1562_v25, %v1387_v18  ;;  %vm1394_vm0 = vweird.f32 %v1562_v25 }
 0x343   : > { %1234 = vst.msk [vmem:[%s2285_s20 + $0x8] sm:$0xff] %vm1232_vm9, %v1231_v26  ;;  %vm1395_vm2 = vmor %vm1393_vm1, %vm1394_vm0 }
 0x344   : > { %v1390_v29 = vsub.f32 1.0, %v1389_v27 }
 0x346   : > { %v1391_v62 = vmul.f32 %v1562_v25, %v1390_v29  ;;  %v1297_v20 = vpop.xlane.xlu1 %1296 }
 0x347   : > { %v1299_v33 = vmul.f32 0.020408163, %v1297_v20 }
 0x348   : > { %v1392_v19 = vadd.f32 %v1562_v25, %v1391_v62 }
 0x349   : > { %v1303_v60 = vadd.f32 %v1301_v32, %v1299_v33 }
 0x34a   : > { %v1396_v36 = vsel %vm1395_vm2, %v1562_v25, %v1392_v19 }
 0x34b   : > { %v1401_v37 = vsel %vm1398_vm3, %v1400_v34, %v1396_v36  ;;  %1305 = vst.msk [vmem:[%s2285_s20 + $0x18] sm:$0xff] %vm1232_vm9, %v1303_v60 }
 0x34c   : > { %v1402_v21 = vmul.f32 %v1401_v37, %v1385_v35 }
 0x34e   : > { %1403 = vst.msk [vmem:[%s2257_s15 + $0x2] sm:$0x1] %vm1281_vm6, %v1402_v21  ;;  %v1358_v41 = vpop.xlane.xlu1 %1357 }
 0x34f   : > { %v1360_v42 = vmul.f32 0.020408163, %v1358_v41 }
 0x351   : > { %v1364_v30 = vadd.f32 %v1362_v40, %v1360_v42 }
 0x353   : > { %1366 = vst.msk [vmem:[%s2285_s20 + $0x28] sm:$0xff] %vm1232_vm9, %v1364_v30 }
 0x354 PF: > { %s18_s21 = sadd.s32 1, %s1588_s21  }
 0x355   : > { %p15_p7 = scmp.ge.s32.totalorder %s18_s21, 4  }
 0x357   :  { %17 = sbr.rel (!%p15_p7) target bundleno = 1 (0x1), region = 90 }
 0x35c   :  { %1439 = vsyncpa [#allocation4], 1 }
 0x35d   :  { %1441 = vsyncpa [#allocation4 + $0x1], 1 }

</bundles_post_ra>
